<compile_context>
chip_gen: v5e
topology: v5e:2x2
jax: 0.10.0
libtpu: 0.0.40
codegen_flags: <defaults>
</compile_context>

<pallas_src>
import functools

import jax
import jax.numpy as jnp
from jax.experimental import pallas as pl
from jax.experimental.pallas import tpu as pltpu

NEG_SLOPE = 0.2     # PyG GATConv default LeakyReLU negative_slope
LN_EPS = 1e-5       # nn.LayerNorm default eps
NEG_INF = -1e30


def gsr_fused_kernel(x_ref, adjb_ref, sumsel_ref, repsel_ref, tilesel_ref, bmask_ref,
                     w1_ref, w_ref, a_ref, aux_ref, wo_ref, ao_ref, bo_ref,
                     node_ref, graph_ref, *, heads, num_hidden):
    """Entire GSRAlternative forward, fused in one kernel (all buffers VMEM-resident).

    Constant selectors (built once in the wrapper, N = nodes, H = heads, F = hidden,
    D = H*F, HN = H*N):
      sumsel  [HN, H]: sumsel[h*N+i, g]  = 1 if g == h          (head-block selector)
      repsel  [HN, N]: repsel[h*N+i, k]  = 1 if k == i          (node replicator)
      tilesel [N, HN]: tilesel[i, h*N+j] = 1 if i == j          (block extractor)
      bmask   [HN, D]: bmask[h*N+i, c]   = 1 if c // F == h     (head column mask)
    """
    f32 = jnp.float32
    sumsel = sumsel_ref[...]
    repsel = repsel_ref[...]
    tilesel = tilesel_ref[...]
    bmask = bmask_ref[...]
    adj_bias = adjb_ref[...]                                            # [N, N]
    # head-stacked additive mask, built once and reused by all hidden layers
    adj_stack = jnp.dot(repsel, adj_bias, preferred_element_type=f32)   # [HN, N]

    x_val = x_ref[...]
    for l in range(num_hidden):
        w = w1_ref[...] if l == 0 else w_ref[l - 1]
        # ---- GATConv: all heads as one sublane-stacked slab ----
        xp = jnp.dot(x_val, w, preferred_element_type=f32)              # [N, D]
        scores = jnp.dot(xp, a_ref[l], preferred_element_type=f32)      # [N, 2H]
        src_t = jnp.transpose(scores[:, :heads])                        # [H, N]
        src_stack = jnp.dot(sumsel, src_t, preferred_element_type=f32)  # [HN, N]
        dst_rep = jnp.dot(repsel, scores[:, heads:],
                          preferred_element_type=f32)                   # [HN, H]
        dst_col = jnp.sum(dst_rep * sumsel, axis=-1, keepdims=True)     # [HN, 1]
        e = dst_col + src_stack                                         # [HN, N]
        e = jnp.where(e > 0.0, e, NEG_SLOPE * e) + adj_stack            # LeakyReLU + mask
        e = e - jnp.max(e, axis=-1, keepdims=True)                      # per-(head,target)
        p = jnp.exp(e)                                                  # masked -> exact 0
        agg = jnp.dot(p, xp, preferred_element_type=f32)                # [HN, D]
        inv = pl.reciprocal(jnp.sum(p, axis=-1, keepdims=True),
                            approx=True)                                # [HN, 1] (EUP)
        y = jnp.dot(tilesel, agg * (inv * bmask),
                    preferred_element_type=f32)                         # [N, D] lane-dense
        # ---- GAT bias + LayerNorm + ReLU ----
        aux = aux_ref[l]                                                # [3, D]
        y = y + aux[0:1, :]
        mu = jnp.mean(y, axis=-1, keepdims=True)
        ms = jnp.mean(y * y, axis=-1, keepdims=True)                    # independent reduces
        var = jnp.maximum(ms - mu * mu, 0.0)
        y = (y - mu) * jax.lax.rsqrt(var + LN_EPS)
        y = y * aux[1:2, :] + aux[2:3, :]
        x_val = jnp.maximum(y, 0.0)                                     # ReLU

    # ---- output GATConv (heads=1, concat=False) + bias, lane-padded to oc_pad ----
    xp = jnp.dot(x_val, wo_ref[...], preferred_element_type=f32)        # [N, OCP]
    scores = jnp.dot(xp, ao_ref[...], preferred_element_type=f32)       # [N, 2]
    sct = jnp.transpose(scores)                                         # [2, N]
    e = scores[:, 1:2] + sct[0:1, :]                                    # dst[i] + src[j]
    e = jnp.where(e > 0.0, e, NEG_SLOPE * e) + adj_bias
    e = e - jnp.max(e, axis=-1, keepdims=True)
    p = jnp.exp(e)
    agg = jnp.dot(p, xp, preferred_element_type=f32)                    # [N, OCP]
    inv = pl.reciprocal(jnp.sum(p, axis=-1, keepdims=True), approx=True)
    y = agg * inv + bo_ref[...]
    node_ref[...] = y                                                   # [N, OCP]
    graph_ref[...] = jnp.mean(y, axis=0, keepdims=True)                 # [1, OCP] mean pool


def init_params(key, in_channels, hidden_channels, out_channels, heads):
    """Deterministic synthetic parameter init (GATConv W / att vectors / bias, LayerNorm)."""
    params = {"hidden": [], "out": None}
    dims_in = [in_channels] + [hidden_channels * heads] * 3
    for d_in in dims_in:
        key, k1, k2, k3 = jax.random.split(key, 4)
        layer = {
            "w": 0.1 * jax.random.normal(k1, (d_in, heads * hidden_channels), jnp.float32),
            "a_src": 0.1 * jax.random.normal(k2, (heads, hidden_channels), jnp.float32),
            "a_dst": 0.1 * jax.random.normal(k3, (heads, hidden_channels), jnp.float32),
            "bias": jnp.zeros((1, heads * hidden_channels), jnp.float32),
            "ln_g": jnp.ones((1, heads * hidden_channels), jnp.float32),
            "ln_b": jnp.zeros((1, heads * hidden_channels), jnp.float32),
        }
        params["hidden"].append(layer)
    key, k1, k2, k3 = jax.random.split(key, 4)
    params["out"] = {
        "w": 0.1 * jax.random.normal(k1, (hidden_channels * heads, out_channels), jnp.float32),
        "a_src": 0.1 * jax.random.normal(k2, (1, out_channels), jnp.float32),
        "a_dst": 0.1 * jax.random.normal(k3, (1, out_channels), jnp.float32),
        "bias": jnp.zeros((1, out_channels), jnp.float32),
    }
    return params


def pack_params(params, in_channels, hidden_channels, out_channels, heads):
    """Pack natural GATConv parameters into the fused-kernel layout."""
    H, F = heads, hidden_channels
    D = H * F
    L = len(params["hidden"])

    in_pad = ((max(in_channels, 8) + 7) // 8) * 8       # sublane-align first-layer K
    w1 = jnp.zeros((in_pad, D), jnp.float32).at[:in_channels, :].set(params["hidden"][0]["w"])
    w_rest = jnp.stack([params["hidden"][l]["w"] for l in range(1, L)])  # [L-1, D, D]

    a_layers, aux_layers = [], []
    for l in range(L):
        lp = params["hidden"][l]
        a = jnp.zeros((D, 2 * H), jnp.float32)
        for h in range(H):
            a = a.at[h * F:(h + 1) * F, h].set(lp["a_src"][h])
            a = a.at[h * F:(h + 1) * F, H + h].set(lp["a_dst"][h])
        a_layers.append(a)
        aux_layers.append(jnp.stack([lp["bias"][0], lp["ln_g"][0], lp["ln_b"][0]]))
    a_stack = jnp.stack(a_layers)       # [L, D, 2H]
    aux_stack = jnp.stack(aux_layers)   # [L, 3, D]

    op = params["out"]
    oc = out_channels
    oc_pad = ((oc + 127) // 128) * 128                  # lane-dense output slab width
    wo = jnp.zeros((D, oc_pad), jnp.float32).at[:, :oc].set(op["w"])
    ao = jnp.zeros((oc_pad, 2), jnp.float32)
    ao = ao.at[:oc, 0].set(op["a_src"][0])
    ao = ao.at[:oc, 1].set(op["a_dst"][0])
    bo = jnp.zeros((1, oc_pad), jnp.float32).at[:, :oc].set(op["bias"])
    return dict(w1=w1, w_rest=w_rest, a_stack=a_stack, aux_stack=aux_stack,
                wo=wo, ao=ao, bo=bo, oc_pad=oc_pad, in_pad=in_pad)


def build_selectors(n, heads, f_out):
    """Constant 0/1 selector matrices for the head-stacked attention slab."""
    hn = heads * n
    d = heads * f_out
    hh = jnp.arange(hn)[:, None] // n
    ii = jnp.arange(hn)[:, None] % n
    sumsel = (hh == jnp.arange(heads)[None, :]).astype(jnp.float32)          # [HN, H]
    repsel = (ii == jnp.arange(n)[None, :]).astype(jnp.float32)              # [HN, N]
    tilesel = jnp.transpose(repsel)                                          # [N, HN]
    bmask = (hh == (jnp.arange(d)[None, :] // f_out)).astype(jnp.float32)    # [HN, D]
    return sumsel, repsel, tilesel, bmask


def build_adj_bias(edge_index, num_nodes):
    """Additive mask: 0 where edge j -> i exists (adj[target, source]) or i == j
    (self-loop, matches add_self_loops + GATConv's internal remove/add), else -1e30."""
    src, dst = edge_index[0], edge_index[1]
    adj = jnp.zeros((num_nodes, num_nodes), jnp.float32)
    adj = adj.at[dst, src].set(1.0)
    idx = jnp.arange(num_nodes)
    adj = adj.at[idx, idx].set(1.0)
    return jnp.where(adj > 0.0, 0.0, NEG_INF)


def gsr_alternative_forward(x, edge_index, params, *, hidden_channels, out_channels, heads):
    n, in_ch = x.shape
    num_hidden = len(params["hidden"])
    packed = pack_params(params, in_ch, hidden_channels, out_channels, heads)
    sumsel, repsel, tilesel, bmask = build_selectors(n, heads, hidden_channels)
    adj_bias = build_adj_bias(edge_index, n)
    x_pad = jnp.zeros((n, packed["in_pad"]), jnp.float32).at[:, :in_ch].set(x)
    oc_pad = packed["oc_pad"]

    kernel = functools.partial(gsr_fused_kernel, heads=heads, num_hidden=num_hidden)
    vmem = pl.BlockSpec(memory_space=pltpu.MemorySpace.VMEM)
    node_pad, graph_pad = pl.pallas_call(
        kernel,
        out_shape=(jax.ShapeDtypeStruct((n, oc_pad), jnp.float32),
                   jax.ShapeDtypeStruct((1, oc_pad), jnp.float32)),
        in_specs=[vmem] * 13,
        out_specs=(vmem, vmem),
    )(x_pad, adj_bias, sumsel, repsel, tilesel, bmask,
      packed["w1"], packed["w_rest"], packed["a_stack"], packed["aux_stack"],
      packed["wo"], packed["ao"], packed["bo"])

    return node_pad[:, :out_channels], graph_pad[:, :out_channels]


if __name__ == "__main__":
    # Small synthetic molecular graph: 8 atoms, 4 input features, hidden=32, heads=4.
    N, IN_CH, HIDDEN, HEADS, OUT_CH = 8, 4, 32, 4, 1

    key = jax.random.PRNGKey(0)
    key, kx = jax.random.split(key)
    x = jax.random.normal(kx, (N, IN_CH), jnp.float32)

    # Directed edge list [2, E] (source row 0, target row 1), undirected pairs.
    edge_index = jnp.array(
        [[0, 1, 1, 2, 2, 3, 3, 4, 4, 5, 5, 6, 6, 7, 7, 0],
         [1, 0, 2, 1, 3, 2, 4, 3, 5, 4, 6, 5, 7, 6, 0, 7]], dtype=jnp.int32)

    params = init_params(key, IN_CH, HIDDEN, OUT_CH, HEADS)

    node_preds, graph_preds = gsr_alternative_forward(
        x, edge_index, params,
        hidden_channels=HIDDEN, out_channels=OUT_CH, heads=HEADS)

    jax.block_until_ready((node_preds, graph_preds))
    assert node_preds.shape == (N, OUT_CH)
    assert graph_preds.shape == (1, OUT_CH)
    print("KERNEL_OK")
</pallas_src>

<mosaic_0001>
module attributes {stable_mosaic.version = 11 : i64} {
  func.func @gsr_fused_kernel(%arg0: memref<8x8xf32, #tpu.memory_space<vmem>>, %arg1: memref<8x8xf32, #tpu.memory_space<vmem>>, %arg2: memref<32x4xf32, #tpu.memory_space<vmem>>, %arg3: memref<32x8xf32, #tpu.memory_space<vmem>>, %arg4: memref<8x32xf32, #tpu.memory_space<vmem>>, %arg5: memref<32x128xf32, #tpu.memory_space<vmem>>, %arg6: memref<8x128xf32, #tpu.memory_space<vmem>>, %arg7: memref<3x128x128xf32, #tpu.memory_space<vmem>>, %arg8: memref<4x128x8xf32, #tpu.memory_space<vmem>>, %arg9: memref<4x3x128xf32, #tpu.memory_space<vmem>>, %arg10: memref<128x128xf32, #tpu.memory_space<vmem>>, %arg11: memref<128x2xf32, #tpu.memory_space<vmem>>, %arg12: memref<1x128xf32, #tpu.memory_space<vmem>>, %arg13: memref<8x128xf32, #tpu.memory_space<vmem>>, %arg14: memref<1x128xf32, #tpu.memory_space<vmem>>) attributes {dimension_semantics = [], scalar_prefetch = 0 : i64, scratch_operands = 0 : i64, tpu.core_type = #tpu.core_type<tc>} {
    %c0 = arith.constant 0 : index
    %c0_0 = arith.constant 0 : index
    %0 = vector.load %arg2[%c0, %c0_0] : memref<32x4xf32, #tpu.memory_space<vmem>>, vector<32x4xf32>
    %c0_1 = arith.constant 0 : index
    %c0_2 = arith.constant 0 : index
    %1 = vector.load %arg3[%c0_1, %c0_2] : memref<32x8xf32, #tpu.memory_space<vmem>>, vector<32x8xf32>
    %c0_3 = arith.constant 0 : index
    %c0_4 = arith.constant 0 : index
    %2 = vector.load %arg4[%c0_3, %c0_4] : memref<8x32xf32, #tpu.memory_space<vmem>>, vector<8x32xf32>
    %c0_5 = arith.constant 0 : index
    %c0_6 = arith.constant 0 : index
    %3 = vector.load %arg5[%c0_5, %c0_6] : memref<32x128xf32, #tpu.memory_space<vmem>>, vector<32x128xf32>
    %c0_7 = arith.constant 0 : index
    %c0_8 = arith.constant 0 : index
    %4 = vector.load %arg1[%c0_7, %c0_8] : memref<8x8xf32, #tpu.memory_space<vmem>>, vector<8x8xf32>
    %cst = arith.constant dense<0.000000e+00> : vector<32x8xf32>
    %5 = tpu.matmul %1, %4, %cst {dimension_numbers = #tpu.dot_dimension_numbers<[1], [0], [0], [1], [0, 0, 1, 1], [], []>} : vector<32x8xf32>, vector<8x8xf32>, vector<32x8xf32> -> vector<32x8xf32>
    %c0_9 = arith.constant 0 : index
    %c0_10 = arith.constant 0 : index
    %6 = vector.load %arg0[%c0_9, %c0_10] : memref<8x8xf32, #tpu.memory_space<vmem>>, vector<8x8xf32>
    %c0_11 = arith.constant 0 : index
    %c0_12 = arith.constant 0 : index
    %7 = vector.load %arg6[%c0_11, %c0_12] : memref<8x128xf32, #tpu.memory_space<vmem>>, vector<8x128xf32>
    %cst_13 = arith.constant dense<0.000000e+00> : vector<8x128xf32>
    %8 = tpu.matmul %6, %7, %cst_13 {dimension_numbers = #tpu.dot_dimension_numbers<[1], [0], [0], [1], [0, 0, 1, 1], [], []>} : vector<8x8xf32>, vector<8x128xf32>, vector<8x128xf32> -> vector<8x128xf32>
    %c0_14 = arith.constant 0 : index
    %c0_15 = arith.constant 0 : index
    %c0_16 = arith.constant 0 : index
    %9 = vector.load %arg8[%c0_14, %c0_15, %c0_16] : memref<4x128x8xf32, #tpu.memory_space<vmem>>, vector<1x128x8xf32>
    %10 = vector.shape_cast %9 : vector<1x128x8xf32> to vector<128x8xf32>
    %cst_17 = arith.constant dense<0.000000e+00> : vector<8x8xf32>
    %11 = tpu.matmul %8, %10, %cst_17 {dimension_numbers = #tpu.dot_dimension_numbers<[1], [0], [0], [1], [0, 0, 1, 1], [], []>} : vector<8x128xf32>, vector<128x8xf32>, vector<8x8xf32> -> vector<8x8xf32>
    %12 = vector.extract_strided_slice %11 {offsets = [0, 0], sizes = [8, 4], strides = [1, 1]} : vector<8x8xf32> to vector<8x4xf32>
    %13 = tpu.transpose %12, [1, 0] : vector<8x4xf32> -> vector<4x8xf32>
    %cst_18 = arith.constant dense<0.000000e+00> : vector<32x8xf32>
    %14 = tpu.matmul %0, %13, %cst_18 {dimension_numbers = #tpu.dot_dimension_numbers<[1], [0], [0], [1], [0, 0, 1, 1], [], []>} : vector<32x4xf32>, vector<4x8xf32>, vector<32x8xf32> -> vector<32x8xf32>
    %15 = vector.extract_strided_slice %11 {offsets = [0, 4], sizes = [8, 4], strides = [1, 1]} : vector<8x8xf32> to vector<8x4xf32>
    %cst_19 = arith.constant dense<0.000000e+00> : vector<32x4xf32>
    %16 = tpu.matmul %1, %15, %cst_19 {dimension_numbers = #tpu.dot_dimension_numbers<[1], [0], [0], [1], [0, 0, 1, 1], [], []>} : vector<32x8xf32>, vector<8x4xf32>, vector<32x4xf32> -> vector<32x4xf32>
    %17 = arith.mulf %16, %0 : vector<32x4xf32>
    %cst_20 = arith.constant dense<0.000000e+00> : vector<32xf32>
    %18 = vector.multi_reduction <add>, %17, %cst_20 [1] : vector<32x4xf32> to vector<32xf32>
    %19 = vector.shape_cast %18 : vector<32xf32> to vector<32x1xf32>
    %20 = vector.broadcast %19 : vector<32x1xf32> to vector<32x8xf32>
    %21 = arith.addf %20, %14 : vector<32x8xf32>
    %cst_21 = arith.constant 0.000000e+00 : f32
    %22 = vector.broadcast %cst_21 : f32 to vector<32x8xf32>
    %23 = arith.cmpf ogt, %21, %22 : vector<32x8xf32>
    %cst_22 = arith.constant 2.000000e-01 : f32
    %24 = vector.broadcast %cst_22 : f32 to vector<32x8xf32>
    %25 = arith.mulf %24, %21 : vector<32x8xf32>
    %26 = arith.select %23, %21, %25 : vector<32x8xi1>, vector<32x8xf32>
    %27 = arith.addf %26, %5 : vector<32x8xf32>
    %cst_23 = arith.constant dense<0xFF800000> : vector<32xf32>
    %28 = vector.multi_reduction <maximumf>, %27, %cst_23 [1] : vector<32x8xf32> to vector<32xf32>
    %29 = vector.shape_cast %28 : vector<32xf32> to vector<32x1xf32>
    %30 = vector.broadcast %29 : vector<32x1xf32> to vector<32x8xf32>
    %31 = arith.subf %27, %30 : vector<32x8xf32>
    %32 = math.exp %31 : vector<32x8xf32>
    %cst_24 = arith.constant dense<0.000000e+00> : vector<32x128xf32>
    %33 = tpu.matmul %32, %8, %cst_24 {dimension_numbers = #tpu.dot_dimension_numbers<[1], [0], [0], [1], [0, 0, 1, 1], [], []>} : vector<32x8xf32>, vector<8x128xf32>, vector<32x128xf32> -> vector<32x128xf32>
    %cst_25 = arith.constant dense<0.000000e+00> : vector<32xf32>
    %34 = vector.multi_reduction <add>, %32, %cst_25 [1] : vector<32x8xf32> to vector<32xf32>
    %35 = vector.shape_cast %34 : vector<32xf32> to vector<32x1xf32>
    %36 = tpu.reciprocal %35 {approx = true} : vector<32x1xf32> -> vector<32x1xf32>
    %37 = vector.broadcast %36 : vector<32x1xf32> to vector<32x128xf32>
    %38 = arith.mulf %37, %3 : vector<32x128xf32>
    %39 = arith.mulf %33, %38 : vector<32x128xf32>
    %cst_26 = arith.constant dense<0.000000e+00> : vector<8x128xf32>
    %40 = tpu.matmul %2, %39, %cst_26 {dimension_numbers = #tpu.dot_dimension_numbers<[1], [0], [0], [1], [0, 0, 1, 1], [], []>} : vector<8x32xf32>, vector<32x128xf32>, vector<8x128xf32> -> vector<8x128xf32>
    %c0_27 = arith.constant 0 : index
    %c0_28 = arith.constant 0 : index
    %c0_29 = arith.constant 0 : index
    %41 = vector.load %arg9[%c0_27, %c0_28, %c0_29] : memref<4x3x128xf32, #tpu.memory_space<vmem>>, vector<1x3x128xf32>
    %42 = vector.shape_cast %41 : vector<1x3x128xf32> to vector<3x128xf32>
    %43 = vector.extract_strided_slice %42 {offsets = [0, 0], sizes = [1, 128], strides = [1, 1]} : vector<3x128xf32> to vector<1x128xf32>
    %44 = vector.broadcast %43 : vector<1x128xf32> to vector<8x128xf32>
    %45 = arith.addf %40, %44 : vector<8x128xf32>
    %cst_30 = arith.constant dense<0.000000e+00> : vector<8xf32>
    %46 = vector.multi_reduction <add>, %45, %cst_30 [1] : vector<8x128xf32> to vector<8xf32>
    %47 = vector.shape_cast %46 : vector<8xf32> to vector<8x1xf32>
    %cst_31 = arith.constant 1.280000e+02 : f32
    %48 = vector.broadcast %cst_31 : f32 to vector<8x1xf32>
    %49 = arith.divf %47, %48 : vector<8x1xf32>
    %50 = arith.mulf %45, %45 : vector<8x128xf32>
    %cst_32 = arith.constant dense<0.000000e+00> : vector<8xf32>
    %51 = vector.multi_reduction <add>, %50, %cst_32 [1] : vector<8x128xf32> to vector<8xf32>
    %52 = vector.shape_cast %51 : vector<8xf32> to vector<8x1xf32>
    %cst_33 = arith.constant 1.280000e+02 : f32
    %53 = vector.broadcast %cst_33 : f32 to vector<8x1xf32>
    %54 = arith.divf %52, %53 : vector<8x1xf32>
    %55 = arith.mulf %49, %49 : vector<8x1xf32>
    %56 = arith.subf %54, %55 : vector<8x1xf32>
    %cst_34 = arith.constant 0.000000e+00 : f32
    %57 = vector.broadcast %cst_34 : f32 to vector<8x1xf32>
    %58 = arith.maximumf %56, %57 : vector<8x1xf32>
    %59 = vector.broadcast %49 : vector<8x1xf32> to vector<8x128xf32>
    %60 = arith.subf %45, %59 : vector<8x128xf32>
    %cst_35 = arith.constant 9.99999974E-6 : f32
    %61 = vector.broadcast %cst_35 : f32 to vector<8x1xf32>
    %62 = arith.addf %58, %61 : vector<8x1xf32>
    %63 = math.rsqrt %62 : vector<8x1xf32>
    %64 = vector.broadcast %63 : vector<8x1xf32> to vector<8x128xf32>
    %65 = arith.mulf %60, %64 : vector<8x128xf32>
    %66 = vector.extract_strided_slice %42 {offsets = [1, 0], sizes = [1, 128], strides = [1, 1]} : vector<3x128xf32> to vector<1x128xf32>
    %67 = vector.broadcast %66 : vector<1x128xf32> to vector<8x128xf32>
    %68 = arith.mulf %65, %67 : vector<8x128xf32>
    %69 = vector.extract_strided_slice %42 {offsets = [2, 0], sizes = [1, 128], strides = [1, 1]} : vector<3x128xf32> to vector<1x128xf32>
    %70 = vector.broadcast %69 : vector<1x128xf32> to vector<8x128xf32>
    %71 = arith.addf %68, %70 : vector<8x128xf32>
    %cst_36 = arith.constant 0.000000e+00 : f32
    %72 = vector.broadcast %cst_36 : f32 to vector<8x128xf32>
    %73 = arith.maximumf %71, %72 : vector<8x128xf32>
    %c0_37 = arith.constant 0 : index
    %c0_38 = arith.constant 0 : index
    %c0_39 = arith.constant 0 : index
    %74 = vector.load %arg7[%c0_37, %c0_38, %c0_39] : memref<3x128x128xf32, #tpu.memory_space<vmem>>, vector<1x128x128xf32>
    %75 = vector.shape_cast %74 : vector<1x128x128xf32> to vector<128x128xf32>
    %cst_40 = arith.constant dense<0.000000e+00> : vector<8x128xf32>
    %76 = tpu.matmul %73, %75, %cst_40 {dimension_numbers = #tpu.dot_dimension_numbers<[1], [0], [0], [1], [0, 0, 1, 1], [], []>} : vector<8x128xf32>, vector<128x128xf32>, vector<8x128xf32> -> vector<8x128xf32>
    %c1 = arith.constant 1 : index
    %c0_41 = arith.constant 0 : index
    %c0_42 = arith.constant 0 : index
    %77 = vector.load %arg8[%c1, %c0_41, %c0_42] : memref<4x128x8xf32, #tpu.memory_space<vmem>>, vector<1x128x8xf32>
    %78 = vector.shape_cast %77 : vector<1x128x8xf32> to vector<128x8xf32>
    %cst_43 = arith.constant dense<0.000000e+00> : vector<8x8xf32>
    %79 = tpu.matmul %76, %78, %cst_43 {dimension_numbers = #tpu.dot_dimension_numbers<[1], [0], [0], [1], [0, 0, 1, 1], [], []>} : vector<8x128xf32>, vector<128x8xf32>, vector<8x8xf32> -> vector<8x8xf32>
    %80 = vector.extract_strided_slice %79 {offsets = [0, 0], sizes = [8, 4], strides = [1, 1]} : vector<8x8xf32> to vector<8x4xf32>
    %81 = tpu.transpose %80, [1, 0] : vector<8x4xf32> -> vector<4x8xf32>
    %cst_44 = arith.constant dense<0.000000e+00> : vector<32x8xf32>
    %82 = tpu.matmul %0, %81, %cst_44 {dimension_numbers = #tpu.dot_dimension_numbers<[1], [0], [0], [1], [0, 0, 1, 1], [], []>} : vector<32x4xf32>, vector<4x8xf32>, vector<32x8xf32> -> vector<32x8xf32>
    %83 = vector.extract_strided_slice %79 {offsets = [0, 4], sizes = [8, 4], strides = [1, 1]} : vector<8x8xf32> to vector<8x4xf32>
    %cst_45 = arith.constant dense<0.000000e+00> : vector<32x4xf32>
    %84 = tpu.matmul %1, %83, %cst_45 {dimension_numbers = #tpu.dot_dimension_numbers<[1], [0], [0], [1], [0, 0, 1, 1], [], []>} : vector<32x8xf32>, vector<8x4xf32>, vector<32x4xf32> -> vector<32x4xf32>
    %85 = arith.mulf %84, %0 : vector<32x4xf32>
    %cst_46 = arith.constant dense<0.000000e+00> : vector<32xf32>
    %86 = vector.multi_reduction <add>, %85, %cst_46 [1] : vector<32x4xf32> to vector<32xf32>
    %87 = vector.shape_cast %86 : vector<32xf32> to vector<32x1xf32>
    %88 = vector.broadcast %87 : vector<32x1xf32> to vector<32x8xf32>
    %89 = arith.addf %88, %82 : vector<32x8xf32>
    %cst_47 = arith.constant 0.000000e+00 : f32
    %90 = vector.broadcast %cst_47 : f32 to vector<32x8xf32>
    %91 = arith.cmpf ogt, %89, %90 : vector<32x8xf32>
    %cst_48 = arith.constant 2.000000e-01 : f32
    %92 = vector.broadcast %cst_48 : f32 to vector<32x8xf32>
    %93 = arith.mulf %92, %89 : vector<32x8xf32>
    %94 = arith.select %91, %89, %93 : vector<32x8xi1>, vector<32x8xf32>
    %95 = arith.addf %94, %5 : vector<32x8xf32>
    %cst_49 = arith.constant dense<0xFF800000> : vector<32xf32>
    %96 = vector.multi_reduction <maximumf>, %95, %cst_49 [1] : vector<32x8xf32> to vector<32xf32>
    %97 = vector.shape_cast %96 : vector<32xf32> to vector<32x1xf32>
    %98 = vector.broadcast %97 : vector<32x1xf32> to vector<32x8xf32>
    %99 = arith.subf %95, %98 : vector<32x8xf32>
    %100 = math.exp %99 : vector<32x8xf32>
    %cst_50 = arith.constant dense<0.000000e+00> : vector<32x128xf32>
    %101 = tpu.matmul %100, %76, %cst_50 {dimension_numbers = #tpu.dot_dimension_numbers<[1], [0], [0], [1], [0, 0, 1, 1], [], []>} : vector<32x8xf32>, vector<8x128xf32>, vector<32x128xf32> -> vector<32x128xf32>
    %cst_51 = arith.constant dense<0.000000e+00> : vector<32xf32>
    %102 = vector.multi_reduction <add>, %100, %cst_51 [1] : vector<32x8xf32> to vector<32xf32>
    %103 = vector.shape_cast %102 : vector<32xf32> to vector<32x1xf32>
    %104 = tpu.reciprocal %103 {approx = true} : vector<32x1xf32> -> vector<32x1xf32>
    %105 = vector.broadcast %104 : vector<32x1xf32> to vector<32x128xf32>
    %106 = arith.mulf %105, %3 : vector<32x128xf32>
    %107 = arith.mulf %101, %106 : vector<32x128xf32>
    %cst_52 = arith.constant dense<0.000000e+00> : vector<8x128xf32>
    %108 = tpu.matmul %2, %107, %cst_52 {dimension_numbers = #tpu.dot_dimension_numbers<[1], [0], [0], [1], [0, 0, 1, 1], [], []>} : vector<8x32xf32>, vector<32x128xf32>, vector<8x128xf32> -> vector<8x128xf32>
    %c1_53 = arith.constant 1 : index
    %c0_54 = arith.constant 0 : index
    %c0_55 = arith.constant 0 : index
    %109 = vector.load %arg9[%c1_53, %c0_54, %c0_55] : memref<4x3x128xf32, #tpu.memory_space<vmem>>, vector<1x3x128xf32>
    %110 = vector.shape_cast %109 : vector<1x3x128xf32> to vector<3x128xf32>
    %111 = vector.extract_strided_slice %110 {offsets = [0, 0], sizes = [1, 128], strides = [1, 1]} : vector<3x128xf32> to vector<1x128xf32>
    %112 = vector.broadcast %111 : vector<1x128xf32> to vector<8x128xf32>
    %113 = arith.addf %108, %112 : vector<8x128xf32>
    %cst_56 = arith.constant dense<0.000000e+00> : vector<8xf32>
    %114 = vector.multi_reduction <add>, %113, %cst_56 [1] : vector<8x128xf32> to vector<8xf32>
    %115 = vector.shape_cast %114 : vector<8xf32> to vector<8x1xf32>
    %cst_57 = arith.constant 1.280000e+02 : f32
    %116 = vector.broadcast %cst_57 : f32 to vector<8x1xf32>
    %117 = arith.divf %115, %116 : vector<8x1xf32>
    %118 = arith.mulf %113, %113 : vector<8x128xf32>
    %cst_58 = arith.constant dense<0.000000e+00> : vector<8xf32>
    %119 = vector.multi_reduction <add>, %118, %cst_58 [1] : vector<8x128xf32> to vector<8xf32>
    %120 = vector.shape_cast %119 : vector<8xf32> to vector<8x1xf32>
    %cst_59 = arith.constant 1.280000e+02 : f32
    %121 = vector.broadcast %cst_59 : f32 to vector<8x1xf32>
    %122 = arith.divf %120, %121 : vector<8x1xf32>
    %123 = arith.mulf %117, %117 : vector<8x1xf32>
    %124 = arith.subf %122, %123 : vector<8x1xf32>
    %cst_60 = arith.constant 0.000000e+00 : f32
    %125 = vector.broadcast %cst_60 : f32 to vector<8x1xf32>
    %126 = arith.maximumf %124, %125 : vector<8x1xf32>
    %127 = vector.broadcast %117 : vector<8x1xf32> to vector<8x128xf32>
    %128 = arith.subf %113, %127 : vector<8x128xf32>
    %cst_61 = arith.constant 9.99999974E-6 : f32
    %129 = vector.broadcast %cst_61 : f32 to vector<8x1xf32>
    %130 = arith.addf %126, %129 : vector<8x1xf32>
    %131 = math.rsqrt %130 : vector<8x1xf32>
    %132 = vector.broadcast %131 : vector<8x1xf32> to vector<8x128xf32>
    %133 = arith.mulf %128, %132 : vector<8x128xf32>
    %134 = vector.extract_strided_slice %110 {offsets = [1, 0], sizes = [1, 128], strides = [1, 1]} : vector<3x128xf32> to vector<1x128xf32>
    %135 = vector.broadcast %134 : vector<1x128xf32> to vector<8x128xf32>
    %136 = arith.mulf %133, %135 : vector<8x128xf32>
    %137 = vector.extract_strided_slice %110 {offsets = [2, 0], sizes = [1, 128], strides = [1, 1]} : vector<3x128xf32> to vector<1x128xf32>
    %138 = vector.broadcast %137 : vector<1x128xf32> to vector<8x128xf32>
    %139 = arith.addf %136, %138 : vector<8x128xf32>
    %cst_62 = arith.constant 0.000000e+00 : f32
    %140 = vector.broadcast %cst_62 : f32 to vector<8x128xf32>
    %141 = arith.maximumf %139, %140 : vector<8x128xf32>
    %c1_63 = arith.constant 1 : index
    %c0_64 = arith.constant 0 : index
    %c0_65 = arith.constant 0 : index
    %142 = vector.load %arg7[%c1_63, %c0_64, %c0_65] : memref<3x128x128xf32, #tpu.memory_space<vmem>>, vector<1x128x128xf32>
    %143 = vector.shape_cast %142 : vector<1x128x128xf32> to vector<128x128xf32>
    %cst_66 = arith.constant dense<0.000000e+00> : vector<8x128xf32>
    %144 = tpu.matmul %141, %143, %cst_66 {dimension_numbers = #tpu.dot_dimension_numbers<[1], [0], [0], [1], [0, 0, 1, 1], [], []>} : vector<8x128xf32>, vector<128x128xf32>, vector<8x128xf32> -> vector<8x128xf32>
    %c2 = arith.constant 2 : index
    %c0_67 = arith.constant 0 : index
    %c0_68 = arith.constant 0 : index
    %145 = vector.load %arg8[%c2, %c0_67, %c0_68] : memref<4x128x8xf32, #tpu.memory_space<vmem>>, vector<1x128x8xf32>
    %146 = vector.shape_cast %145 : vector<1x128x8xf32> to vector<128x8xf32>
    %cst_69 = arith.constant dense<0.000000e+00> : vector<8x8xf32>
    %147 = tpu.matmul %144, %146, %cst_69 {dimension_numbers = #tpu.dot_dimension_numbers<[1], [0], [0], [1], [0, 0, 1, 1], [], []>} : vector<8x128xf32>, vector<128x8xf32>, vector<8x8xf32> -> vector<8x8xf32>
    %148 = vector.extract_strided_slice %147 {offsets = [0, 0], sizes = [8, 4], strides = [1, 1]} : vector<8x8xf32> to vector<8x4xf32>
    %149 = tpu.transpose %148, [1, 0] : vector<8x4xf32> -> vector<4x8xf32>
    %cst_70 = arith.constant dense<0.000000e+00> : vector<32x8xf32>
    %150 = tpu.matmul %0, %149, %cst_70 {dimension_numbers = #tpu.dot_dimension_numbers<[1], [0], [0], [1], [0, 0, 1, 1], [], []>} : vector<32x4xf32>, vector<4x8xf32>, vector<32x8xf32> -> vector<32x8xf32>
    %151 = vector.extract_strided_slice %147 {offsets = [0, 4], sizes = [8, 4], strides = [1, 1]} : vector<8x8xf32> to vector<8x4xf32>
    %cst_71 = arith.constant dense<0.000000e+00> : vector<32x4xf32>
    %152 = tpu.matmul %1, %151, %cst_71 {dimension_numbers = #tpu.dot_dimension_numbers<[1], [0], [0], [1], [0, 0, 1, 1], [], []>} : vector<32x8xf32>, vector<8x4xf32>, vector<32x4xf32> -> vector<32x4xf32>
    %153 = arith.mulf %152, %0 : vector<32x4xf32>
    %cst_72 = arith.constant dense<0.000000e+00> : vector<32xf32>
    %154 = vector.multi_reduction <add>, %153, %cst_72 [1] : vector<32x4xf32> to vector<32xf32>
    %155 = vector.shape_cast %154 : vector<32xf32> to vector<32x1xf32>
    %156 = vector.broadcast %155 : vector<32x1xf32> to vector<32x8xf32>
    %157 = arith.addf %156, %150 : vector<32x8xf32>
    %cst_73 = arith.constant 0.000000e+00 : f32
    %158 = vector.broadcast %cst_73 : f32 to vector<32x8xf32>
    %159 = arith.cmpf ogt, %157, %158 : vector<32x8xf32>
    %cst_74 = arith.constant 2.000000e-01 : f32
    %160 = vector.broadcast %cst_74 : f32 to vector<32x8xf32>
    %161 = arith.mulf %160, %157 : vector<32x8xf32>
    %162 = arith.select %159, %157, %161 : vector<32x8xi1>, vector<32x8xf32>
    %163 = arith.addf %162, %5 : vector<32x8xf32>
    %cst_75 = arith.constant dense<0xFF800000> : vector<32xf32>
    %164 = vector.multi_reduction <maximumf>, %163, %cst_75 [1] : vector<32x8xf32> to vector<32xf32>
    %165 = vector.shape_cast %164 : vector<32xf32> to vector<32x1xf32>
    %166 = vector.broadcast %165 : vector<32x1xf32> to vector<32x8xf32>
    %167 = arith.subf %163, %166 : vector<32x8xf32>
    %168 = math.exp %167 : vector<32x8xf32>
    %cst_76 = arith.constant dense<0.000000e+00> : vector<32x128xf32>
    %169 = tpu.matmul %168, %144, %cst_76 {dimension_numbers = #tpu.dot_dimension_numbers<[1], [0], [0], [1], [0, 0, 1, 1], [], []>} : vector<32x8xf32>, vector<8x128xf32>, vector<32x128xf32> -> vector<32x128xf32>
    %cst_77 = arith.constant dense<0.000000e+00> : vector<32xf32>
    %170 = vector.multi_reduction <add>, %168, %cst_77 [1] : vector<32x8xf32> to vector<32xf32>
    %171 = vector.shape_cast %170 : vector<32xf32> to vector<32x1xf32>
    %172 = tpu.reciprocal %171 {approx = true} : vector<32x1xf32> -> vector<32x1xf32>
    %173 = vector.broadcast %172 : vector<32x1xf32> to vector<32x128xf32>
    %174 = arith.mulf %173, %3 : vector<32x128xf32>
    %175 = arith.mulf %169, %174 : vector<32x128xf32>
    %cst_78 = arith.constant dense<0.000000e+00> : vector<8x128xf32>
    %176 = tpu.matmul %2, %175, %cst_78 {dimension_numbers = #tpu.dot_dimension_numbers<[1], [0], [0], [1], [0, 0, 1, 1], [], []>} : vector<8x32xf32>, vector<32x128xf32>, vector<8x128xf32> -> vector<8x128xf32>
    %c2_79 = arith.constant 2 : index
    %c0_80 = arith.constant 0 : index
    %c0_81 = arith.constant 0 : index
    %177 = vector.load %arg9[%c2_79, %c0_80, %c0_81] : memref<4x3x128xf32, #tpu.memory_space<vmem>>, vector<1x3x128xf32>
    %178 = vector.shape_cast %177 : vector<1x3x128xf32> to vector<3x128xf32>
    %179 = vector.extract_strided_slice %178 {offsets = [0, 0], sizes = [1, 128], strides = [1, 1]} : vector<3x128xf32> to vector<1x128xf32>
    %180 = vector.broadcast %179 : vector<1x128xf32> to vector<8x128xf32>
    %181 = arith.addf %176, %180 : vector<8x128xf32>
    %cst_82 = arith.constant dense<0.000000e+00> : vector<8xf32>
    %182 = vector.multi_reduction <add>, %181, %cst_82 [1] : vector<8x128xf32> to vector<8xf32>
    %183 = vector.shape_cast %182 : vector<8xf32> to vector<8x1xf32>
    %cst_83 = arith.constant 1.280000e+02 : f32
    %184 = vector.broadcast %cst_83 : f32 to vector<8x1xf32>
    %185 = arith.divf %183, %184 : vector<8x1xf32>
    %186 = arith.mulf %181, %181 : vector<8x128xf32>
    %cst_84 = arith.constant dense<0.000000e+00> : vector<8xf32>
    %187 = vector.multi_reduction <add>, %186, %cst_84 [1] : vector<8x128xf32> to vector<8xf32>
    %188 = vector.shape_cast %187 : vector<8xf32> to vector<8x1xf32>
    %cst_85 = arith.constant 1.280000e+02 : f32
    %189 = vector.broadcast %cst_85 : f32 to vector<8x1xf32>
    %190 = arith.divf %188, %189 : vector<8x1xf32>
    %191 = arith.mulf %185, %185 : vector<8x1xf32>
    %192 = arith.subf %190, %191 : vector<8x1xf32>
    %cst_86 = arith.constant 0.000000e+00 : f32
    %193 = vector.broadcast %cst_86 : f32 to vector<8x1xf32>
    %194 = arith.maximumf %192, %193 : vector<8x1xf32>
    %195 = vector.broadcast %185 : vector<8x1xf32> to vector<8x128xf32>
    %196 = arith.subf %181, %195 : vector<8x128xf32>
    %cst_87 = arith.constant 9.99999974E-6 : f32
    %197 = vector.broadcast %cst_87 : f32 to vector<8x1xf32>
    %198 = arith.addf %194, %197 : vector<8x1xf32>
    %199 = math.rsqrt %198 : vector<8x1xf32>
    %200 = vector.broadcast %199 : vector<8x1xf32> to vector<8x128xf32>
    %201 = arith.mulf %196, %200 : vector<8x128xf32>
    %202 = vector.extract_strided_slice %178 {offsets = [1, 0], sizes = [1, 128], strides = [1, 1]} : vector<3x128xf32> to vector<1x128xf32>
    %203 = vector.broadcast %202 : vector<1x128xf32> to vector<8x128xf32>
    %204 = arith.mulf %201, %203 : vector<8x128xf32>
    %205 = vector.extract_strided_slice %178 {offsets = [2, 0], sizes = [1, 128], strides = [1, 1]} : vector<3x128xf32> to vector<1x128xf32>
    %206 = vector.broadcast %205 : vector<1x128xf32> to vector<8x128xf32>
    %207 = arith.addf %204, %206 : vector<8x128xf32>
    %cst_88 = arith.constant 0.000000e+00 : f32
    %208 = vector.broadcast %cst_88 : f32 to vector<8x128xf32>
    %209 = arith.maximumf %207, %208 : vector<8x128xf32>
    %c2_89 = arith.constant 2 : index
    %c0_90 = arith.constant 0 : index
    %c0_91 = arith.constant 0 : index
    %210 = vector.load %arg7[%c2_89, %c0_90, %c0_91] : memref<3x128x128xf32, #tpu.memory_space<vmem>>, vector<1x128x128xf32>
    %211 = vector.shape_cast %210 : vector<1x128x128xf32> to vector<128x128xf32>
    %cst_92 = arith.constant dense<0.000000e+00> : vector<8x128xf32>
    %212 = tpu.matmul %209, %211, %cst_92 {dimension_numbers = #tpu.dot_dimension_numbers<[1], [0], [0], [1], [0, 0, 1, 1], [], []>} : vector<8x128xf32>, vector<128x128xf32>, vector<8x128xf32> -> vector<8x128xf32>
    %c3 = arith.constant 3 : index
    %c0_93 = arith.constant 0 : index
    %c0_94 = arith.constant 0 : index
    %213 = vector.load %arg8[%c3, %c0_93, %c0_94] : memref<4x128x8xf32, #tpu.memory_space<vmem>>, vector<1x128x8xf32>
    %214 = vector.shape_cast %213 : vector<1x128x8xf32> to vector<128x8xf32>
    %cst_95 = arith.constant dense<0.000000e+00> : vector<8x8xf32>
    %215 = tpu.matmul %212, %214, %cst_95 {dimension_numbers = #tpu.dot_dimension_numbers<[1], [0], [0], [1], [0, 0, 1, 1], [], []>} : vector<8x128xf32>, vector<128x8xf32>, vector<8x8xf32> -> vector<8x8xf32>
    %216 = vector.extract_strided_slice %215 {offsets = [0, 0], sizes = [8, 4], strides = [1, 1]} : vector<8x8xf32> to vector<8x4xf32>
    %217 = tpu.transpose %216, [1, 0] : vector<8x4xf32> -> vector<4x8xf32>
    %cst_96 = arith.constant dense<0.000000e+00> : vector<32x8xf32>
    %218 = tpu.matmul %0, %217, %cst_96 {dimension_numbers = #tpu.dot_dimension_numbers<[1], [0], [0], [1], [0, 0, 1, 1], [], []>} : vector<32x4xf32>, vector<4x8xf32>, vector<32x8xf32> -> vector<32x8xf32>
    %219 = vector.extract_strided_slice %215 {offsets = [0, 4], sizes = [8, 4], strides = [1, 1]} : vector<8x8xf32> to vector<8x4xf32>
    %cst_97 = arith.constant dense<0.000000e+00> : vector<32x4xf32>
    %220 = tpu.matmul %1, %219, %cst_97 {dimension_numbers = #tpu.dot_dimension_numbers<[1], [0], [0], [1], [0, 0, 1, 1], [], []>} : vector<32x8xf32>, vector<8x4xf32>, vector<32x4xf32> -> vector<32x4xf32>
    %221 = arith.mulf %220, %0 : vector<32x4xf32>
    %cst_98 = arith.constant dense<0.000000e+00> : vector<32xf32>
    %222 = vector.multi_reduction <add>, %221, %cst_98 [1] : vector<32x4xf32> to vector<32xf32>
    %223 = vector.shape_cast %222 : vector<32xf32> to vector<32x1xf32>
    %224 = vector.broadcast %223 : vector<32x1xf32> to vector<32x8xf32>
    %225 = arith.addf %224, %218 : vector<32x8xf32>
    %cst_99 = arith.constant 0.000000e+00 : f32
    %226 = vector.broadcast %cst_99 : f32 to vector<32x8xf32>
    %227 = arith.cmpf ogt, %225, %226 : vector<32x8xf32>
    %cst_100 = arith.constant 2.000000e-01 : f32
    %228 = vector.broadcast %cst_100 : f32 to vector<32x8xf32>
    %229 = arith.mulf %228, %225 : vector<32x8xf32>
    %230 = arith.select %227, %225, %229 : vector<32x8xi1>, vector<32x8xf32>
    %231 = arith.addf %230, %5 : vector<32x8xf32>
    %cst_101 = arith.constant dense<0xFF800000> : vector<32xf32>
    %232 = vector.multi_reduction <maximumf>, %231, %cst_101 [1] : vector<32x8xf32> to vector<32xf32>
    %233 = vector.shape_cast %232 : vector<32xf32> to vector<32x1xf32>
    %234 = vector.broadcast %233 : vector<32x1xf32> to vector<32x8xf32>
    %235 = arith.subf %231, %234 : vector<32x8xf32>
    %236 = math.exp %235 : vector<32x8xf32>
    %cst_102 = arith.constant dense<0.000000e+00> : vector<32x128xf32>
    %237 = tpu.matmul %236, %212, %cst_102 {dimension_numbers = #tpu.dot_dimension_numbers<[1], [0], [0], [1], [0, 0, 1, 1], [], []>} : vector<32x8xf32>, vector<8x128xf32>, vector<32x128xf32> -> vector<32x128xf32>
    %cst_103 = arith.constant dense<0.000000e+00> : vector<32xf32>
    %238 = vector.multi_reduction <add>, %236, %cst_103 [1] : vector<32x8xf32> to vector<32xf32>
    %239 = vector.shape_cast %238 : vector<32xf32> to vector<32x1xf32>
    %240 = tpu.reciprocal %239 {approx = true} : vector<32x1xf32> -> vector<32x1xf32>
    %241 = vector.broadcast %240 : vector<32x1xf32> to vector<32x128xf32>
    %242 = arith.mulf %241, %3 : vector<32x128xf32>
    %243 = arith.mulf %237, %242 : vector<32x128xf32>
    %cst_104 = arith.constant dense<0.000000e+00> : vector<8x128xf32>
    %244 = tpu.matmul %2, %243, %cst_104 {dimension_numbers = #tpu.dot_dimension_numbers<[1], [0], [0], [1], [0, 0, 1, 1], [], []>} : vector<8x32xf32>, vector<32x128xf32>, vector<8x128xf32> -> vector<8x128xf32>
    %c3_105 = arith.constant 3 : index
    %c0_106 = arith.constant 0 : index
    %c0_107 = arith.constant 0 : index
    %245 = vector.load %arg9[%c3_105, %c0_106, %c0_107] : memref<4x3x128xf32, #tpu.memory_space<vmem>>, vector<1x3x128xf32>
    %246 = vector.shape_cast %245 : vector<1x3x128xf32> to vector<3x128xf32>
    %247 = vector.extract_strided_slice %246 {offsets = [0, 0], sizes = [1, 128], strides = [1, 1]} : vector<3x128xf32> to vector<1x128xf32>
    %248 = vector.broadcast %247 : vector<1x128xf32> to vector<8x128xf32>
    %249 = arith.addf %244, %248 : vector<8x128xf32>
    %cst_108 = arith.constant dense<0.000000e+00> : vector<8xf32>
    %250 = vector.multi_reduction <add>, %249, %cst_108 [1] : vector<8x128xf32> to vector<8xf32>
    %251 = vector.shape_cast %250 : vector<8xf32> to vector<8x1xf32>
    %cst_109 = arith.constant 1.280000e+02 : f32
    %252 = vector.broadcast %cst_109 : f32 to vector<8x1xf32>
    %253 = arith.divf %251, %252 : vector<8x1xf32>
    %254 = arith.mulf %249, %249 : vector<8x128xf32>
    %cst_110 = arith.constant dense<0.000000e+00> : vector<8xf32>
    %255 = vector.multi_reduction <add>, %254, %cst_110 [1] : vector<8x128xf32> to vector<8xf32>
    %256 = vector.shape_cast %255 : vector<8xf32> to vector<8x1xf32>
    %cst_111 = arith.constant 1.280000e+02 : f32
    %257 = vector.broadcast %cst_111 : f32 to vector<8x1xf32>
    %258 = arith.divf %256, %257 : vector<8x1xf32>
    %259 = arith.mulf %253, %253 : vector<8x1xf32>
    %260 = arith.subf %258, %259 : vector<8x1xf32>
    %cst_112 = arith.constant 0.000000e+00 : f32
    %261 = vector.broadcast %cst_112 : f32 to vector<8x1xf32>
    %262 = arith.maximumf %260, %261 : vector<8x1xf32>
    %263 = vector.broadcast %253 : vector<8x1xf32> to vector<8x128xf32>
    %264 = arith.subf %249, %263 : vector<8x128xf32>
    %cst_113 = arith.constant 9.99999974E-6 : f32
    %265 = vector.broadcast %cst_113 : f32 to vector<8x1xf32>
    %266 = arith.addf %262, %265 : vector<8x1xf32>
    %267 = math.rsqrt %266 : vector<8x1xf32>
    %268 = vector.broadcast %267 : vector<8x1xf32> to vector<8x128xf32>
    %269 = arith.mulf %264, %268 : vector<8x128xf32>
    %270 = vector.extract_strided_slice %246 {offsets = [1, 0], sizes = [1, 128], strides = [1, 1]} : vector<3x128xf32> to vector<1x128xf32>
    %271 = vector.broadcast %270 : vector<1x128xf32> to vector<8x128xf32>
    %272 = arith.mulf %269, %271 : vector<8x128xf32>
    %273 = vector.extract_strided_slice %246 {offsets = [2, 0], sizes = [1, 128], strides = [1, 1]} : vector<3x128xf32> to vector<1x128xf32>
    %274 = vector.broadcast %273 : vector<1x128xf32> to vector<8x128xf32>
    %275 = arith.addf %272, %274 : vector<8x128xf32>
    %cst_114 = arith.constant 0.000000e+00 : f32
    %276 = vector.broadcast %cst_114 : f32 to vector<8x128xf32>
    %277 = arith.maximumf %275, %276 : vector<8x128xf32>
    %c0_115 = arith.constant 0 : index
    %c0_116 = arith.constant 0 : index
    %278 = vector.load %arg10[%c0_115, %c0_116] : memref<128x128xf32, #tpu.memory_space<vmem>>, vector<128x128xf32>
    %cst_117 = arith.constant dense<0.000000e+00> : vector<8x128xf32>
    %279 = tpu.matmul %277, %278, %cst_117 {dimension_numbers = #tpu.dot_dimension_numbers<[1], [0], [0], [1], [0, 0, 1, 1], [], []>} : vector<8x128xf32>, vector<128x128xf32>, vector<8x128xf32> -> vector<8x128xf32>
    %c0_118 = arith.constant 0 : index
    %c0_119 = arith.constant 0 : index
    %280 = vector.load %arg11[%c0_118, %c0_119] : memref<128x2xf32, #tpu.memory_space<vmem>>, vector<128x2xf32>
    %cst_120 = arith.constant dense<0.000000e+00> : vector<8x2xf32>
    %281 = tpu.matmul %279, %280, %cst_120 {dimension_numbers = #tpu.dot_dimension_numbers<[1], [0], [0], [1], [0, 0, 1, 1], [], []>} : vector<8x128xf32>, vector<128x2xf32>, vector<8x2xf32> -> vector<8x2xf32>
    %282 = tpu.transpose %281, [1, 0] : vector<8x2xf32> -> vector<2x8xf32>
    %283 = vector.extract_strided_slice %281 {offsets = [0, 1], sizes = [8, 1], strides = [1, 1]} : vector<8x2xf32> to vector<8x1xf32>
    %284 = vector.extract_strided_slice %282 {offsets = [0, 0], sizes = [1, 8], strides = [1, 1]} : vector<2x8xf32> to vector<1x8xf32>
    %285 = vector.broadcast %283 : vector<8x1xf32> to vector<8x8xf32>
    %286 = vector.broadcast %284 : vector<1x8xf32> to vector<8x8xf32>
    %287 = arith.addf %285, %286 : vector<8x8xf32>
    %cst_121 = arith.constant 0.000000e+00 : f32
    %288 = vector.broadcast %cst_121 : f32 to vector<8x8xf32>
    %289 = arith.cmpf ogt, %287, %288 : vector<8x8xf32>
    %cst_122 = arith.constant 2.000000e-01 : f32
    %290 = vector.broadcast %cst_122 : f32 to vector<8x8xf32>
    %291 = arith.mulf %290, %287 : vector<8x8xf32>
    %292 = arith.select %289, %287, %291 : vector<8x8xi1>, vector<8x8xf32>
    %293 = arith.addf %292, %4 : vector<8x8xf32>
    %cst_123 = arith.constant dense<0xFF800000> : vector<8xf32>
    %294 = vector.multi_reduction <maximumf>, %293, %cst_123 [1] : vector<8x8xf32> to vector<8xf32>
    %295 = vector.shape_cast %294 : vector<8xf32> to vector<8x1xf32>
    %296 = vector.broadcast %295 : vector<8x1xf32> to vector<8x8xf32>
    %297 = arith.subf %293, %296 : vector<8x8xf32>
    %298 = math.exp %297 : vector<8x8xf32>
    %cst_124 = arith.constant dense<0.000000e+00> : vector<8x128xf32>
    %299 = tpu.matmul %298, %279, %cst_124 {dimension_numbers = #tpu.dot_dimension_numbers<[1], [0], [0], [1], [0, 0, 1, 1], [], []>} : vector<8x8xf32>, vector<8x128xf32>, vector<8x128xf32> -> vector<8x128xf32>
    %cst_125 = arith.constant dense<0.000000e+00> : vector<8xf32>
    %300 = vector.multi_reduction <add>, %298, %cst_125 [1] : vector<8x8xf32> to vector<8xf32>
    %301 = vector.shape_cast %300 : vector<8xf32> to vector<8x1xf32>
    %302 = tpu.reciprocal %301 {approx = true} : vector<8x1xf32> -> vector<8x1xf32>
    %303 = vector.broadcast %302 : vector<8x1xf32> to vector<8x128xf32>
    %304 = arith.mulf %299, %303 : vector<8x128xf32>
    %c0_126 = arith.constant 0 : index
    %c0_127 = arith.constant 0 : index
    %305 = vector.load %arg12[%c0_126, %c0_127] : memref<1x128xf32, #tpu.memory_space<vmem>>, vector<1x128xf32>
    %306 = vector.broadcast %305 : vector<1x128xf32> to vector<8x128xf32>
    %307 = arith.addf %304, %306 : vector<8x128xf32>
    %c0_128 = arith.constant 0 : index
    %c0_129 = arith.constant 0 : index
    %308 = vector.load %arg13[%c0_128, %c0_129] : memref<8x128xf32, #tpu.memory_space<vmem>>, vector<8x128xf32>
    tpu.vector_store %arg13[%c0_128, %c0_129], %307 {strides = array<i32>} : memref<8x128xf32, #tpu.memory_space<vmem>>, vector<8x128xf32>,
    %cst_130 = arith.constant dense<0.000000e+00> : vector<128xf32>
    %309 = vector.multi_reduction <add>, %307, %cst_130 [0] : vector<8x128xf32> to vector<128xf32>
    %310 = vector.shape_cast %309 : vector<128xf32> to vector<1x128xf32>
    %cst_131 = arith.constant 8.000000e+00 : f32
    %311 = vector.broadcast %cst_131 : f32 to vector<1x128xf32>
    %312 = arith.divf %310, %311 : vector<1x128xf32>
    %c0_132 = arith.constant 0 : index
    %c0_133 = arith.constant 0 : index
    %313 = vector.load %arg14[%c0_132, %c0_133] : memref<1x128xf32, #tpu.memory_space<vmem>>, vector<1x128xf32>
    tpu.vector_store %arg14[%c0_132, %c0_133], %312 {strides = array<i32>} : memref<1x128xf32, #tpu.memory_space<vmem>>, vector<1x128xf32>,
    return
  }
}

</mosaic_0001>

<bundles_post_ra>
// kernel: tpu_custom_call.1
= control target key start
LH: loop header
LB: loop body
LE: loop exit
PB: predicated region body
PF: predicated region fallthrough
CT: control target
= control target key end

     0   :  { %20 = vsyncpa [#allocation3], 0  ;;  %vm62_vm0 = vcmask 64512   ;;  %s2770_s0 = inlined_call_operand.vmem [shape: f32[8,8], index: 0, kind: input, shape index: {}]   ;;  %s2771_s1 = inlined_call_operand.vmem [shape: f32[8,8], index: 1, kind: input, shape index: {}]   ;;  %s2772_s2 = inlined_call_operand.vmem [shape: f32[32,4], index: 2, kind: input, shape index: {}]   ;;  %s2773_s3 = inlined_call_operand.vmem [shape: f32[32,8], index: 3, kind: input, shape index: {}]   ;;  %s2774_s4 = inlined_call_operand.vmem [shape: f32[8,32], index: 4, kind: input, shape index: {}]   ;;  %s2775_s5 = inlined_call_operand.vmem [shape: f32[32,128], index: 5, kind: input, shape index: {}]   ;;  %s2776_s6 = inlined_call_operand.vmem [shape: f32[8,128], index: 6, kind: input, shape index: {}]   ;;  %s2777_s7 = inlined_call_operand.vmem [shape: f32[3,128,128], index: 7, kind: input, shape index: {}]   ;;  %s2778_s8 = inlined_call_operand.vmem [shape: f32[4,128,8], index: 8, kind: input, shape index: {}]   ;;  %s2779_s9 = inlined_call_operand.vmem [shape: f32[4,3,128], index: 9, kind: input, shape index: {}]   ;;  %s2780_s10 = inlined_call_operand.vmem [shape: f32[128,128], index: 10, kind: input, shape index: {}]   ;;  %s2781_s11 = inlined_call_operand.vmem [shape: f32[128,2], index: 11, kind: input, shape index: {}]   ;;  %s2782_s12 = inlined_call_operand.vmem [shape: f32[1,128], index: 12, kind: input, shape index: {}]   ;;  %s2783_s13 = inlined_call_operand.hbm [shape: f32[8,128], index: 13, kind: output, shape index: {0}]   ;;  %s2784_s14 = inlined_call_operand.hbm [shape: f32[1,128], index: 14, kind: output, shape index: {1}]  }
   0x1   :  { %v105_v0 = vld [vmem:[%s2776_s6] sm:$0xff]  ;;  %v144_v2 = vld [vmem:[%s2778_s8 + $0x78] sm:$0xff]  ;;  %v143_v3 = vld [vmem:[%s2778_s8 + $0x70] sm:$0xff] }
   0x2   :  { %v104_v1 = vld [vmem:[%s2770_s0] sm:$0xff]  ;;  %124 = vmatpush.msra.mxu1 %v105_v0  ;;  %145 = vmatpush.msra.mxu2 %v144_v2  ;;  %v142_v4 = vld [vmem:[%s2778_s8 + $0x68] sm:$0xff]  ;;  %v140_v7 = vld [vmem:[%s2778_s8 + $0x58] sm:$0xff] }
   0x3   :  { %1575 = vmatmul.msk.f32.vlgmr.msra.gmra.mxu1 %vm62_vm0, %v104_v1  ;;  %v141_v5 = vld [vmem:[%s2778_s8 + $0x60] sm:$0xff] }
   0x4   :  { %146 = vmatpush.msra.mxu2 %v143_v3  ;;  %v61_v6 = vld [vmem:[%s2771_s1] sm:$0xff] }
   0x5   :  { %90 = vmatpush.msra.mxu0 %v61_v6 }
   0x6   :  { %147 = vmatpush.msra.mxu2 %v142_v4 }
   0x7   :  { %21 = vsyncpa [#allocation5], 0  ;;  %v139_v8 = vld [vmem:[%s2778_s8 + $0x50] sm:$0xff]  ;;  %v138_v9 = vld [vmem:[%s2778_s8 + $0x48] sm:$0xff]  ;;  %vm165_vm1 = vcmask 31744   ;;  %s1871_s15 = smov 124  }
   0x8   :  { %148 = vmatpush.msra.mxu2 %v141_v5  ;;  %v137_v10 = vld [vmem:[%s2778_s8 + $0x40] sm:$0xff]  ;;  %v136_v11 = vld [vmem:[%s2778_s8 + $0x38] sm:$0xff]  ;;  %v135_v12 = vld [vmem:[%s2778_s8 + $0x30] sm:$0xff]  ;;  %vm369_vm6 = vcmask 261120   ;;  %s1875_s27 = smov [#allocation2]   ;;  %s1546_s16 = sshll.u32 %s2783_s13, 4  ;;  %s1547_s16 = int_to_ptr.hbm [resolvable:$true] %s1546_s16 }
   0x9   :  { %v134_v13 = vld [vmem:[%s2778_s8 + $0x28] sm:$0xff]  ;;  %v133_v14 = vld [vmem:[%s2778_s8 + $0x20] sm:$0xff]  ;;  %v132_v15 = vld [vmem:[%s2778_s8 + $0x18] sm:$0xff]  ;;  %s1544_s28 = sshll.u32 %s1875_s27, 4  ;;  %s1557_s19 = sshll.u32 %s2784_s14, 4  ;;  %s1545_s28 = int_to_ptr.vmem [resolvable:$true] %s1544_s28  ;;  %s1558_s19 = int_to_ptr.hbm [resolvable:$true] %s1557_s19 }
   0xa   :  { %149 = vmatpush.msra.mxu2 %v140_v7  ;;  %v131_v16 = vld [vmem:[%s2778_s8 + $0x10] sm:$0xff]  ;;  %v130_v17 = vld [vmem:[%s2778_s8 + $0x8] sm:$0xff]  ;;  %v129_v18 = vld [vmem:[%s2778_s8] sm:$0xff] }
   0xb   :  { %v2015_v21 = vld [vmem:[%s2773_s3] sm:$0xff]  ;;  %v2022_v22 = vld [vmem:[%s2773_s3 + $0x8] sm:$0xff]  ;;  %v2029_v23 = vld [vmem:[%s2773_s3 + $0x10] sm:$0xff] }
   0xc   :  { %150 = vmatpush.msra.mxu2 %v139_v8  ;;  %1571 = vmatmul.msk.f32.vlgmr.msra.gmra.mxu0 %vm62_vm0, %v2015_v21  ;;  %v2036_v24 = vld [vmem:[%s2773_s3 + $0x18] sm:$0xff]  ;;  %v2041_v25 = vld [vmem:[%s2772_s2] sm:$0xff]  ;;  %v2050_v27 = vld [vmem:[%s2772_s2 + $0x8] sm:$0xff] }
   0xd   :  { %v2065_v28 = vld [vmem:[%s2772_s2 + $0x10] sm:$0xff]  ;;  %v2072_v29 = vld [vmem:[%s2772_s2 + $0x18] sm:$0xff] }
   0xe   :  { %151 = vmatpush.msra.mxu2 %v138_v9 }
  0x10   :  { %152 = vmatpush.msra.mxu2 %v137_v10 }
  0x12   :  { %153 = vmatpush.msra.mxu2 %v136_v11 }
  0x14   :  { %154 = vmatpush.msra.mxu2 %v135_v12  ;;  %1572 = vmatmul.msk.f32.gmra.mxu0 %vm62_vm0, %v2022_v22 }
  0x16   :  { %155 = vmatpush.msra.mxu2 %v134_v13 }
  0x18   :  { %156 = vmatpush.msra.mxu2 %v133_v14 }
  0x1a   :  { %157 = vmatpush.msra.mxu2 %v132_v15 }
  0x1c   :  { %158 = vmatpush.msra.mxu2 %v131_v16  ;;  %1573 = vmatmul.msk.f32.gmra.mxu0 %vm62_vm0, %v2029_v23 }
  0x1e   :  { %159 = vmatpush.msra.mxu2 %v130_v17 }
  0x20   :  { %160 = vmatpush.msra.mxu2 %v129_v18 }
  0x24   :  { %1574 = vmatmul.msk.f32.gmra.mxu0 %vm62_vm0, %v2036_v24 }
  0x80   :  { %v126_v19 = vpop.f32.mrf.mxu1 }
  0x81   :  { %161 = vmatmul.f32.vlgmr.msra.gmra.mxu2 %v126_v19  ;;  %329 = vmatpush.msrb.mxu0 %v126_v19 }
  0x89   :  { %v2084_v43 = vpop.f32.mrf.mxu0 }
  0x91   :  { %v2087_v50 = vpop.f32.mrf.mxu0 }
  0x99   :  { %v2092_v61 = vpop.f32.mrf.mxu0 }
  0xa1   :  { %v2096_v6 = vpop.f32.mrf.mxu0 }
 0x104   :  { %v162_v20 = vpop.f32.mrf.mxu2 }
 0x105   :  { %210 = vrot.lane.b32.xlu0 %v162_v20, %s1871_s15  ;;  %1576 = vmatpush.xpose.msk.msra.mxu3 %vm165_vm1, %v162_v20 }
 0x108   :  { %1577 = vmatmul.msk.f32.vlgmr.msra.gmra.mxu3 %vm165_vm1, %v2041_v25 }
 0x110   :  { %1578 = vmatmul.msk.f32.gmra.mxu3 %vm165_vm1, %v2050_v27 }
 0x118   :  { %1579 = vmatmul.msk.f32.gmra.mxu3 %vm165_vm1, %v2065_v28 }
 0x120   :  { %1580 = vmatmul.msk.f32.gmra.mxu3 %vm165_vm1, %v2072_v29 }
 0x177   :  { %v211_v26 = vpop.permute.xlu0 %210 }
 0x178   :  { %228 = vmatpush.msrb.mxu1 %v211_v26 }
 0x179   :  { %1581 = vmatmul.msk.f32.vlgmr.msrb.gmra.mxu1 %vm62_vm0, %v2015_v21 }
 0x181   :  { %1582 = vmatmul.msk.f32.gmra.mxu1 %vm62_vm0, %v2022_v22 }
 0x189   :  { %1583 = vmatmul.msk.f32.gmra.mxu1 %vm62_vm0, %v2029_v23 }
 0x18b   :  { %v198_v42 = vpop.f32.mrf.mxu3 }
 0x191   :  { %1584 = vmatmul.msk.f32.gmra.mxu1 %vm62_vm0, %v2036_v24 }
 0x193   :  { %v201_v46 = vpop.f32.mrf.mxu3 }
 0x19b   :  { %v204_v55 = vpop.f32.mrf.mxu3 }
 0x1a3   :  { %v207_v0 = vpop.f32.mrf.mxu3 }
 0x1f6   :  { %v230_v30 = vpop.f32.mrf.mxu1 }
 0x1f7   :  { %v242_v31 = vmul.f32 %v230_v30, %v2041_v25 }
 0x1f9   :  { %v246_v32 = vsel %vm165_vm1, %v242_v31, 0.0 }
 0x1fa   :  { %247 = vadd.xlane.f32.xlu0 %v246_v32 }
 0x1fe   :  { %v233_v33 = vpop.f32.mrf.mxu1 }
 0x1ff   :  { %v243_v34 = vmul.f32 %v233_v33, %v2050_v27 }
 0x201   :  { %v249_v35 = vsel %vm165_vm1, %v243_v34, 0.0 }
 0x202   :  { %250 = vadd.xlane.f32.xlu1 %v249_v35 }
 0x206   :  { %v236_v36 = vpop.f32.mrf.mxu1 }
 0x207   :  { %v244_v37 = vmul.f32 %v236_v36, %v2065_v28 }
 0x209   :  { %v252_v38 = vsel %vm165_vm1, %v244_v37, 0.0 }
 0x20a   :  { %253 = vadd.xlane.f32.xlu1 %v252_v38 }
 0x20e   :  { %v239_v39 = vpop.f32.mrf.mxu1 }
 0x20f   :  { %v245_v40 = vmul.f32 %v239_v39, %v2072_v29 }
 0x211   :  { %v255_v41 = vsel %vm165_vm1, %v245_v40, 0.0 }
 0x212   :  { %256 = vadd.xlane.f32.xlu2 %v255_v41 }
 0x26d   :  { %v248_v44 = vpop.xlane.xlu0 %247 }
 0x26e   :  { %v258_v45 = vadd.f32 %v248_v44, %v198_v42 }
 0x270   :  { %vm262_vm2 = vcmp.gt.f32.partialorder %v258_v45, 0.0  ;;  %v266_v47 = vmul.f32 0.2, %v258_v45 }
 0x272   :  { %v270_v48 = vsel %vm262_vm2, %v258_v45, %v266_v47  ;;  %v2116_v47 = vld [vmem:[%s2775_s5 + $0x18] sm:$0xff] }
 0x273   :  { %v274_v49 = vadd.f32 %v270_v48, %v2084_v43 }
 0x275   :  { %v251_v51 = vpop.xlane.xlu1 %250  ;;  %v278_v52 = vsel %vm62_vm0, %v274_v49, -inf }
 0x276   :  { %v259_v53 = vadd.f32 %v251_v51, %v201_v46  ;;  %279 = vmax.xlane.f32.xlu2 %v278_v52  ;;  %v2111_v46 = vld [vmem:[%s2775_s5 + $0x10] sm:$0xff] }
 0x278   :  { %vm263_vm3 = vcmp.gt.f32.partialorder %v259_v53, 0.0  ;;  %v267_v54 = vmul.f32 0.2, %v259_v53 }
 0x27a   :  { %v271_v56 = vsel %vm263_vm3, %v259_v53, %v267_v54 }
 0x27b   :  { %v275_v57 = vadd.f32 %v271_v56, %v2087_v50 }
 0x27d   :  { %v254_v58 = vpop.xlane.xlu1 %253  ;;  %v281_v59 = vsel %vm62_vm0, %v275_v57, -inf }
 0x27e   :  { %v260_v60 = vadd.f32 %v254_v58, %v204_v55  ;;  %282 = vmax.xlane.f32.xlu1 %v281_v59  ;;  %v2128_v58 = vld [vmem:[%s2775_s5] sm:$0xff] }
 0x280   :  { %vm264_vm4 = vcmp.gt.f32.partialorder %v260_v60, 0.0  ;;  %v268_v62 = vmul.f32 0.2, %v260_v60 }
 0x282   :  { %v272_v63 = vsel %vm264_vm4, %v260_v60, %v268_v62 }
 0x283   :  { %v276_v1 = vadd.f32 %v272_v63, %v2092_v61 }
 0x285   :  { %v257_v2 = vpop.xlane.xlu2 %256  ;;  %v284_v3 = vsel %vm62_vm0, %v276_v1, -inf }
 0x286   :  { %v261_v4 = vadd.f32 %v257_v2, %v207_v0  ;;  %285 = vmax.xlane.f32.xlu2 %v284_v3  ;;  %v2142_v2 = vld [vmem:[%s2779_s9] sm:$0x7] }
 0x287   :  { %v368_v3 = vperm.slane %v2142_v2, 0 }
 0x288   :  { %vm265_vm5 = vcmp.gt.f32.partialorder %v261_v4, 0.0  ;;  %v269_v5 = vmul.f32 0.2, %v261_v4 }
 0x28a   :  { %v273_v7 = vsel %vm265_vm5, %v261_v4, %v269_v5 }
 0x28b   :  { %v277_v8 = vadd.f32 %v273_v7, %v2096_v6 }
 0x28d   :  { %v287_v9 = vsel %vm62_vm0, %v277_v8, -inf }
 0x28e   :  { %288 = vmax.xlane.f32.xlu1 %v287_v9  ;;  %v443_v9 = vld [vmem:[%s2777_s7 + $0x78] sm:$0xff] }
 0x28f   :  { %444 = vmatpush.msra.mxu1 %v443_v9 }
 0x2e9   :  { %v280_v10 = vpop.xlane.xlu2 %279 }
 0x2ea   :  { %v290_v11 = vsub.f32 %v274_v49, %v280_v10  ;;  %v442_v10 = vld [vmem:[%s2777_s7 + $0x70] sm:$0xff] }
 0x2eb   :  { %445 = vmatpush.msra.mxu1 %v442_v10  ;;  %v1594_v10 = vld [vmem:[%s2778_s8 + $0xa0] sm:$0xff] }
 0x2ec   :  { %v294_v12 = vmul.f32 1.442695, %v290_v11  ;;  %v441_v11 = vld [vmem:[%s2777_s7 + $0x68] sm:$0xff] }
 0x2ed   :  { %446 = vmatpush.msra.mxu1 %v441_v11 }
 0x2ee   :  { %1725 = vpow2.f32 %v294_v12 }
 0x2f1   :  { %v283_v13 = vpop.xlane.xlu1 %282 }
 0x2f2   :  { %v291_v14 = vsub.f32 %v275_v57, %v283_v13  ;;  %v2123_v57 = vld [vmem:[%s2775_s5 + $0x8] sm:$0xff]  ;;  %v440_v13 = vld [vmem:[%s2777_s7 + $0x60] sm:$0xff] }
 0x2f3   :  { %447 = vmatpush.msra.mxu1 %v440_v13 }
 0x2f4   :  { %v1726_v15 = vpop.eup %1725  ;;  %v296_v16 = vmul.f32 1.442695, %v291_v14 }
 0x2f5   :  { %1585 = vmatmul.msk.f32.vlgmr.msrb.gmra.mxu0 %vm62_vm0, %v1726_v15  ;;  %v343_v35 = vsel %vm62_vm0, %v1726_v15, 0.0  ;;  %v439_v15 = vld [vmem:[%s2777_s7 + $0x58] sm:$0xff] }
 0x2f6   :  { %1727 = vpow2.f32 %v296_v16  ;;  %448 = vmatpush.msra.mxu1 %v439_v15  ;;  %v438_v16 = vld [vmem:[%s2777_s7 + $0x50] sm:$0xff] }
 0x2f8   :  { %449 = vmatpush.msra.mxu1 %v438_v16  ;;  %v425_v16 = vperm.slane %v2142_v2, 2 }
 0x2f9   :  { %v286_v17 = vpop.xlane.xlu2 %285 }
 0x2fa   :  { %v292_v18 = vsub.f32 %v276_v1, %v286_v17  ;;  %v2135_v1 = vld [vmem:[%s2774_s4] sm:$0xff] }
 0x2fc   :  { %v1728_v19 = vpop.eup %1727  ;;  %v298_v20 = vmul.f32 1.442695, %v292_v18  ;;  %v437_v18 = vld [vmem:[%s2777_s7 + $0x48] sm:$0xff] }
 0x2fd   :  { %1586 = vmatmul.msk.f32.gmra.mxu0 %vm62_vm0, %v1728_v19  ;;  %v346_v37 = vsel %vm62_vm0, %v1728_v19, 0.0  ;;  %450 = vmatpush.msra.mxu1 %v437_v18  ;;  %v436_v19 = vld [vmem:[%s2777_s7 + $0x40] sm:$0xff]  ;;  %v1592_v18 = vld [vmem:[%s2778_s8 + $0x90] sm:$0xff] }
 0x2fe   :  { %1729 = vpow2.f32 %v298_v20 }
 0x2ff   :  { %451 = vmatpush.msra.mxu1 %v436_v19 }
 0x301   :  { %v289_v26 = vpop.xlane.xlu1 %288 }
 0x302   :  { %v293_v30 = vsub.f32 %v277_v8, %v289_v26  ;;  %v1872_v8 = vmov 128.0   ;;  %v435_v26 = vld [vmem:[%s2777_s7 + $0x38] sm:$0xff] }
 0x303   :  { %452 = vmatpush.msra.mxu1 %v435_v26 }
 0x304   :  { %v1730_v31 = vpop.eup %1729  ;;  %v300_v32 = vmul.f32 1.442695, %v293_v30  ;;  %v434_v30 = vld [vmem:[%s2777_s7 + $0x30] sm:$0xff] }
 0x305   :  { %1587 = vmatmul.msk.f32.gmra.mxu0 %vm62_vm0, %v1730_v31  ;;  %v349_v33 = vsel %vm62_vm0, %v1730_v31, 0.0  ;;  %453 = vmatpush.msra.mxu1 %v434_v30 }
 0x306   :  { %1731 = vpow2.f32 %v300_v32  ;;  %350 = vadd.xlane.f32.xlu1 %v349_v33  ;;  %v433_v32 = vld [vmem:[%s2777_s7 + $0x28] sm:$0xff]  ;;  %v432_v33 = vld [vmem:[%s2777_s7 + $0x20] sm:$0xff] }
 0x307   :  { %454 = vmatpush.msra.mxu1 %v433_v32 }
 0x309   :  { %455 = vmatpush.msra.mxu1 %v432_v33 }
 0x30c   :  { %v1732_v34 = vpop.eup %1731 }
 0x30d   :  { %1588 = vmatmul.msk.f32.gmra.mxu0 %vm62_vm0, %v1732_v34  ;;  %v352_v36 = vsel %vm62_vm0, %v1732_v34, 0.0  ;;  %v431_v34 = vld [vmem:[%s2777_s7 + $0x18] sm:$0xff] }
 0x30e   :  { %344 = vadd.xlane.f32.xlu1 %v343_v35  ;;  %353 = vadd.xlane.f32.xlu2 %v352_v36  ;;  %v430_v36 = vld [vmem:[%s2777_s7 + $0x10] sm:$0xff] }
 0x30f   :  { %456 = vmatpush.msra.mxu1 %v431_v34 }
 0x311   :  { %457 = vmatpush.msra.mxu1 %v430_v36 }
 0x316   :  { %347 = vadd.xlane.f32.xlu2 %v346_v37 }
 0x372   :  { %v331_v38 = vpop.f32.mrf.mxu0 }
 0x379   :  { %v351_v40 = vpop.xlane.xlu1 %350 }
 0x37a   :  { %v334_v39 = vpop.f32.mrf.mxu0  ;;  %1733 = vrcp.f32 %v351_v40 }
 0x380   :  { %v1734_v45 = vpop.eup %1733 }
 0x381   :  { %v354_v41 = vpop.xlane.xlu2 %353  ;;  %v345_v44 = vpop.xlane.xlu1 %344  ;;  %v361_v49 = vmul.f32 %v1734_v45, %v2111_v46 }
 0x382   :  { %1735 = vrcp.f32 %v354_v41  ;;  %v337_v42 = vpop.f32.mrf.mxu0  ;;  %v428_v41 = vld [vmem:[%s2777_s7] sm:$0xff] }
 0x383   :  { %1737 = vrcp.f32 %v345_v44  ;;  %v365_v55 = vmul.f32 %v361_v49, %v337_v42  ;;  %v1604_v49 = vld [vmem:[%s2778_s8 + $0xf0] sm:$0xff] }
 0x388   :  { %v1736_v48 = vpop.eup %1735 }
 0x389   :  { %v348_v51 = vpop.xlane.xlu2 %347  ;;  %v362_v52 = vmul.f32 %v1736_v48, %v2116_v47  ;;  %v1738_v56 = vpop.eup %1737  ;;  %v1605_v48 = vld [vmem:[%s2778_s8 + $0xf8] sm:$0xff] }
 0x38a   :  { %1739 = vrcp.f32 %v348_v51  ;;  %v340_v53 = vpop.f32.mrf.mxu0  ;;  %v359_v62 = vmul.f32 %v1738_v56, %v2128_v58  ;;  %481 = vmatpush.msrb.mxu2 %v1605_v48  ;;  %v1600_v56 = vld [vmem:[%s2778_s8 + $0xd0] sm:$0xff] }
 0x38b   :  { %v366_v54 = vmul.f32 %v362_v52, %v340_v53  ;;  %1741 = vrcp.f32 %v1872_v8  ;;  %v1603_v52 = vld [vmem:[%s2778_s8 + $0xe8] sm:$0xff] }
 0x38c   :  { %v363_v0 = vmul.f32 %v359_v62, %v331_v38  ;;  %v429_v38 = vld [vmem:[%s2777_s7 + $0x8] sm:$0xff]  ;;  %482 = vmatpush.msrb.mxu2 %v1604_v49  ;;  %v1598_v62 = vld [vmem:[%s2778_s8 + $0xc0] sm:$0xff] }
 0x38d   :  { %385 = vmatpush.msrb.mxu3 %v366_v54  ;;  %458 = vmatpush.msra.mxu1 %v429_v38  ;;  %v1602_v54 = vld [vmem:[%s2778_s8 + $0xe0] sm:$0xff]  ;;  %v1595_v8 = vld [vmem:[%s2778_s8 + $0xa8] sm:$0xff] }
 0x38e   :  { %483 = vmatpush.msrb.mxu2 %v1603_v52 }
 0x38f   :  { %386 = vmatpush.msrb.mxu3 %v365_v55  ;;  %459 = vmatpush.msra.mxu1 %v428_v41  ;;  %v1601_v55 = vld [vmem:[%s2778_s8 + $0xd8] sm:$0xff] }
 0x390   :  { %v1740_v59 = vpop.eup %1739  ;;  %484 = vmatpush.msrb.mxu2 %v1602_v54 }
 0x391   :  { %v360_v60 = vmul.f32 %v1740_v59, %v2123_v57  ;;  %v1742_v12 = vpop.eup %1741  ;;  %v1599_v59 = vld [vmem:[%s2778_s8 + $0xc8] sm:$0xff] }
 0x392   :  { %v396_v14 = vmul.f32 128.0, %v1742_v12  ;;  %vm400_vm7 = vweird.f32 %v1742_v12  ;;  %485 = vmatpush.msrb.mxu2 %v1601_v55 }
 0x393   :  { %v364_v63 = vmul.f32 %v360_v60, %v334_v39 }
 0x394   :  { %v397_v17 = vsub.f32 1.0, %v396_v14  ;;  %486 = vmatpush.msrb.mxu2 %v1600_v56  ;;  %v1593_v14 = vld [vmem:[%s2778_s8 + $0x98] sm:$0xff] }
 0x395   :  { %387 = vmatpush.msrb.mxu3 %v364_v63 }
 0x396   :  { %v398_v20 = vmul.f32 %v1742_v12, %v397_v17  ;;  %487 = vmatpush.msrb.mxu2 %v1599_v59 }
 0x397   :  { %388 = vmatpush.msrb.mxu3 %v363_v0  ;;  %v1597_v0 = vld [vmem:[%s2778_s8 + $0xb8] sm:$0xff] }
 0x398   :  { %1589 = vmatmul.msk.f32.vlgmr.msrb.gmra.mxu3 %vm369_vm6, %v2135_v1  ;;  %v399_v31 = vadd.f32 %v1742_v12, %v398_v20  ;;  %488 = vmatpush.msrb.mxu2 %v1598_v62 }
 0x39a   :  { %v2189_v35 = vsel %vm400_vm7, %v1742_v12, %v399_v31  ;;  %489 = vmatpush.msrb.mxu2 %v1597_v0  ;;  %v423_v12 = vperm.slane %v2142_v2, 1  ;;  %v1590_v2 = vld [vmem:[%s2778_s8 + $0x80] sm:$0xff] }
 0x41b   :  { %v390_v4 = vpop.f32.mrf.mxu3 }
 0x41c   :  { %v2145_v5 = vadd.f32 %v390_v4, %v368_v3  ;;  %v1596_v4 = vld [vmem:[%s2778_s8 + $0xb0] sm:$0xff] }
 0x41d   :  { %490 = vmatpush.msrb.mxu2 %v1596_v4 }
 0x41e   :  { %393 = vadd.xlane.f32.xlu2 %v2145_v5  ;;  %v403_v7 = vmul.f32 %v2145_v5, %v2145_v5 }
 0x41f   :  { %491 = vmatpush.msrb.mxu2 %v1595_v8 }
 0x420   :  { %404 = vadd.xlane.f32.xlu1 %v403_v7 }
 0x421   :  { %492 = vmatpush.msrb.mxu2 %v1594_v10 }
 0x423   :  { %493 = vmatpush.msrb.mxu2 %v1593_v14 }
 0x425   :  { %494 = vmatpush.msrb.mxu2 %v1592_v18 }
 0x491   :  { %v394_v37 = vpop.xlane.xlu2 %393 }
 0x492   :  { %v402_v39 = vmul.f32 %v2189_v35, %v394_v37 }
 0x493   :  { %v405_v40 = vpop.xlane.xlu1 %404 }
 0x494   :  { %v407_v42 = vmul.f32 %v402_v39, %v402_v39  ;;  %v406_v44 = vmul.f32 %v405_v40, %v2189_v35  ;;  %v410_v13 = vsub.f32 %v2145_v5, %v402_v39  ;;  %v1591_v5 = vld [vmem:[%s2778_s8 + $0x88] sm:$0xff] }
 0x495   :  { %495 = vmatpush.msrb.mxu2 %v1591_v5 }
 0x496   :  { %v408_v45 = vsub.f32 %v406_v44, %v407_v42 }
 0x497   :  { %496 = vmatpush.msrb.mxu2 %v1590_v2 }
 0x498   :  { %v409_v51 = vmax.f32 %v408_v45, 0.0 }
 0x49a   :  { %v411_v53 = vadd.f32 1e-05, %v409_v51 }
 0x49c   :  { %1743 = vrsqrt.f32 %v411_v53  ;;  %vm418_vm9 = vweird.f32 %v411_v53 }
 0x4a2   :  { %v1744_v60 = vpop.eup %1743 }
 0x4a3   :  { %v413_v63 = vmul.f32 %v1744_v60, %v411_v53  ;;  %vm419_vm8 = vweird.f32 %v1744_v60 }
 0x4a4   :  { %vm420_vm10 = vmor %vm418_vm9, %vm419_vm8 }
 0x4a5   :  { %v414_v3 = vmul.f32 %v1744_v60, %v413_v63 }
 0x4a7   :  { %v415_v7 = vmul.f32 0.5, %v414_v3 }
 0x4a9   :  { %v416_v9 = vsub.f32 1.5, %v415_v7 }
 0x4ab   :  { %v417_v11 = vmul.f32 %v1744_v60, %v416_v9 }
 0x4ad   :  { %v421_v15 = vsel %vm420_vm10, %v1744_v60, %v417_v11 }
 0x4ae   :  { %v422_v17 = vmul.f32 %v421_v15, %v410_v13 }
 0x4b0   :  { %v424_v19 = vmul.f32 %v423_v12, %v422_v17 }
 0x4b2   :  { %v426_v20 = vadd.f32 %v425_v16, %v424_v19 }
 0x4b4   :  { %v427_v26 = vmax.f32 %v426_v20, 0.0 }
 0x4b6   :  { %460 = vmatmul.f32.vlgmr.msra.gmra.mxu1 %v427_v26 }
 0x533   :  { %v461_v30 = vpop.f32.mrf.mxu1 }
 0x534   :  { %497 = vmatmul.f32.vlgmr.msrb.gmra.mxu2 %v461_v30  ;;  %652 = vmatpush.msra.mxu0 %v461_v30 }
 0x5b7   :  { %v498_v31 = vpop.f32.mrf.mxu2 }
 0x5b8   :  { %533 = vrot.lane.b32.xlu2 %v498_v31, %s1871_s15  ;;  %1606 = vmatpush.xpose.msk.msra.mxu3 %vm165_vm1, %v498_v31 }
 0x5bb   :  { %1607 = vmatmul.msk.f32.vlgmr.msra.gmra.mxu3 %vm165_vm1, %v2041_v25 }
 0x5c3   :  { %1608 = vmatmul.msk.f32.gmra.mxu3 %vm165_vm1, %v2050_v27 }
 0x5cb   :  { %1609 = vmatmul.msk.f32.gmra.mxu3 %vm165_vm1, %v2065_v28 }
 0x5d3   :  { %1610 = vmatmul.msk.f32.gmra.mxu3 %vm165_vm1, %v2072_v29 }
 0x612   :  { %v534_v32 = vpop.permute.xlu2 %533 }
 0x613   :  { %551 = vmatpush.msrb.mxu1 %v534_v32 }
 0x614   :  { %1611 = vmatmul.msk.f32.vlgmr.msrb.gmra.mxu1 %vm62_vm0, %v2015_v21 }
 0x61c   :  { %1612 = vmatmul.msk.f32.gmra.mxu1 %vm62_vm0, %v2022_v22 }
 0x624   :  { %1613 = vmatmul.msk.f32.gmra.mxu1 %vm62_vm0, %v2029_v23 }
 0x62c   :  { %1614 = vmatmul.msk.f32.gmra.mxu1 %vm62_vm0, %v2036_v24 }
 0x63e   :  { %v521_v49 = vpop.f32.mrf.mxu3 }
 0x646   :  { %v524_v53 = vpop.f32.mrf.mxu3 }
 0x64e   :  { %v527_v0 = vpop.f32.mrf.mxu3 }
 0x656   :  { %v530_v12 = vpop.f32.mrf.mxu3 }
 0x691   :  { %v553_v33 = vpop.f32.mrf.mxu1 }
 0x692   :  { %v565_v34 = vmul.f32 %v553_v33, %v2041_v25 }
 0x694   :  { %v569_v36 = vsel %vm165_vm1, %v565_v34, 0.0 }
 0x695   :  { %570 = vadd.xlane.f32.xlu0 %v569_v36 }
 0x699   :  { %v556_v37 = vpop.f32.mrf.mxu1 }
 0x69a   :  { %v566_v38 = vmul.f32 %v556_v37, %v2050_v27 }
 0x69c   :  { %v572_v39 = vsel %vm165_vm1, %v566_v38, 0.0 }
 0x69d   :  { %573 = vadd.xlane.f32.xlu1 %v572_v39 }
 0x6a1   :  { %v559_v40 = vpop.f32.mrf.mxu1 }
 0x6a2   :  { %v567_v41 = vmul.f32 %v559_v40, %v2065_v28 }
 0x6a4   :  { %v575_v42 = vsel %vm165_vm1, %v567_v41, 0.0 }
 0x6a5   :  { %576 = vadd.xlane.f32.xlu0 %v575_v42 }
 0x6a9   :  { %v562_v44 = vpop.f32.mrf.mxu1 }
 0x6aa   :  { %v568_v45 = vmul.f32 %v562_v44, %v2072_v29 }
 0x6ac   :  { %v578_v48 = vsel %vm165_vm1, %v568_v45, 0.0 }
 0x6ad   :  { %579 = vadd.xlane.f32.xlu1 %v578_v48 }
 0x708   :  { %v571_v51 = vpop.xlane.xlu0 %570 }
 0x709   :  { %v581_v52 = vadd.f32 %v571_v51, %v521_v49 }
 0x70b   :  { %vm585_vm11 = vcmp.gt.f32.partialorder %v581_v52, 0.0  ;;  %v589_v54 = vmul.f32 0.2, %v581_v52 }
 0x70d   :  { %v593_v55 = vsel %vm585_vm11, %v581_v52, %v589_v54 }
 0x70e   :  { %v597_v56 = vadd.f32 %v593_v55, %v2084_v43 }
 0x710   :  { %v574_v59 = vpop.xlane.xlu1 %573  ;;  %v601_v60 = vsel %vm62_vm0, %v597_v56, -inf }
 0x711   :  { %v582_v62 = vadd.f32 %v574_v59, %v524_v53  ;;  %602 = vmax.xlane.f32.xlu0 %v601_v60 }
 0x713   :  { %vm586_vm12 = vcmp.gt.f32.partialorder %v582_v62, 0.0  ;;  %v590_v63 = vmul.f32 0.2, %v582_v62 }
 0x715   :  { %v594_v3 = vsel %vm586_vm12, %v582_v62, %v590_v63 }
 0x716   :  { %v598_v4 = vadd.f32 %v594_v3, %v2087_v50 }
 0x718   :  { %v577_v7 = vpop.xlane.xlu0 %576  ;;  %v604_v8 = vsel %vm62_vm0, %v598_v4, -inf }
 0x719   :  { %v583_v9 = vadd.f32 %v577_v7, %v527_v0  ;;  %605 = vmax.xlane.f32.xlu1 %v604_v8 }
 0x71b   :  { %vm587_vm13 = vcmp.gt.f32.partialorder %v583_v9, 0.0  ;;  %v591_v10 = vmul.f32 0.2, %v583_v9 }
 0x71d   :  { %v595_v11 = vsel %vm587_vm13, %v583_v9, %v591_v10 }
 0x71e   :  { %v599_v13 = vadd.f32 %v595_v11, %v2092_v61 }
 0x720   :  { %v580_v14 = vpop.xlane.xlu1 %579  ;;  %v607_v15 = vsel %vm62_vm0, %v599_v13, -inf }
 0x721   :  { %v584_v16 = vadd.f32 %v580_v14, %v530_v12  ;;  %608 = vmax.xlane.f32.xlu2 %v607_v15  ;;  %v2304_v15 = vld [vmem:[%s2779_s9 + $0x4] sm:$0x7] }
 0x723   :  { %vm588_vm14 = vcmp.gt.f32.partialorder %v584_v16, 0.0  ;;  %v592_v17 = vmul.f32 0.2, %v584_v16 }
 0x725   :  { %v596_v18 = vsel %vm588_vm14, %v584_v16, %v592_v17  ;;  %v692_v16 = vperm.slane %v2304_v15, 0 }
 0x726   :  { %v600_v19 = vadd.f32 %v596_v18, %v2096_v6 }
 0x728   :  { %v610_v5 = vsel %vm62_vm0, %v600_v19, -inf }
 0x729   :  { %611 = vmax.xlane.f32.xlu0 %v610_v5  ;;  %v1636_v5 = vld [vmem:[%s2777_s7 + $0xf8] sm:$0xff] }
 0x72a   :  { %758 = vmatpush.msrb.mxu3 %v1636_v5  ;;  %v1640_v5 = vld [vmem:[%s2778_s8 + $0x118] sm:$0xff] }
 0x784   :  { %v603_v20 = vpop.xlane.xlu0 %602 }
 0x785   :  { %v613_v26 = vsub.f32 %v597_v56, %v603_v20  ;;  %v1635_v20 = vld [vmem:[%s2777_s7 + $0xf0] sm:$0xff] }
 0x786   :  { %759 = vmatpush.msrb.mxu3 %v1635_v20 }
 0x787   :  { %v617_v2 = vmul.f32 1.442695, %v613_v26  ;;  %v1634_v26 = vld [vmem:[%s2777_s7 + $0xe8] sm:$0xff] }
 0x788   :  { %760 = vmatpush.msrb.mxu3 %v1634_v26  ;;  %v738_v26 = vperm.slane %v2304_v15, 2 }
 0x789   :  { %1745 = vpow2.f32 %v617_v2  ;;  %v1633_v2 = vld [vmem:[%s2777_s7 + $0xe0] sm:$0xff] }
 0x78a   :  { %761 = vmatpush.msrb.mxu3 %v1633_v2 }
 0x78c   :  { %v606_v30 = vpop.xlane.xlu1 %605 }
 0x78d   :  { %v614_v31 = vsub.f32 %v598_v4, %v606_v30  ;;  %v1632_v30 = vld [vmem:[%s2777_s7 + $0xd8] sm:$0xff] }
 0x78e   :  { %762 = vmatpush.msrb.mxu3 %v1632_v30  ;;  %v1639_v30 = vld [vmem:[%s2778_s8 + $0x110] sm:$0xff] }
 0x78f   :  { %v1746_v32 = vpop.eup %1745  ;;  %v619_v33 = vmul.f32 1.442695, %v614_v31  ;;  %v1631_v31 = vld [vmem:[%s2777_s7 + $0xd0] sm:$0xff] }
 0x790   :  { %1615 = vmatmul.msk.f32.vlgmr.msra.gmra.mxu0 %vm62_vm0, %v1746_v32  ;;  %v666_v48 = vsel %vm62_vm0, %v1746_v32, 0.0  ;;  %763 = vmatpush.msrb.mxu3 %v1631_v31  ;;  %v1630_v32 = vld [vmem:[%s2777_s7 + $0xc8] sm:$0xff] }
 0x791   :  { %1747 = vpow2.f32 %v619_v33  ;;  %v1629_v33 = vld [vmem:[%s2777_s7 + $0xc0] sm:$0xff] }
 0x792   :  { %764 = vmatpush.msrb.mxu3 %v1630_v32 }
 0x794   :  { %v609_v34 = vpop.xlane.xlu2 %608  ;;  %765 = vmatpush.msrb.mxu3 %v1629_v33 }
 0x795   :  { %v615_v36 = vsub.f32 %v599_v13, %v609_v34  ;;  %v1628_v34 = vld [vmem:[%s2777_s7 + $0xb8] sm:$0xff] }
 0x796   :  { %766 = vmatpush.msrb.mxu3 %v1628_v34 }
 0x797   :  { %v1748_v37 = vpop.eup %1747  ;;  %v621_v38 = vmul.f32 1.442695, %v615_v36  ;;  %v1627_v36 = vld [vmem:[%s2777_s7 + $0xb0] sm:$0xff] }
 0x798   :  { %1616 = vmatmul.msk.f32.gmra.mxu0 %vm62_vm0, %v1748_v37  ;;  %v669_v51 = vsel %vm62_vm0, %v1748_v37, 0.0  ;;  %767 = vmatpush.msrb.mxu3 %v1627_v36  ;;  %v1626_v37 = vld [vmem:[%s2777_s7 + $0xa8] sm:$0xff] }
 0x799   :  { %1749 = vpow2.f32 %v621_v38  ;;  %v1625_v38 = vld [vmem:[%s2777_s7 + $0xa0] sm:$0xff] }
 0x79a   :  { %768 = vmatpush.msrb.mxu3 %v1626_v37 }
 0x79c   :  { %v612_v39 = vpop.xlane.xlu0 %611  ;;  %769 = vmatpush.msrb.mxu3 %v1625_v38 }
 0x79d   :  { %v616_v40 = vsub.f32 %v600_v19, %v612_v39  ;;  %v1624_v39 = vld [vmem:[%s2777_s7 + $0x98] sm:$0xff] }
 0x79e   :  { %770 = vmatpush.msrb.mxu3 %v1624_v39 }
 0x79f   :  { %v1750_v41 = vpop.eup %1749  ;;  %v623_v42 = vmul.f32 1.442695, %v616_v40  ;;  %v1623_v40 = vld [vmem:[%s2777_s7 + $0x90] sm:$0xff] }
 0x7a0   :  { %1617 = vmatmul.msk.f32.gmra.mxu0 %vm62_vm0, %v1750_v41  ;;  %v672_v44 = vsel %vm62_vm0, %v1750_v41, 0.0  ;;  %771 = vmatpush.msrb.mxu3 %v1623_v40 }
 0x7a1   :  { %1751 = vpow2.f32 %v623_v42  ;;  %673 = vadd.xlane.f32.xlu0 %v672_v44  ;;  %v1622_v42 = vld [vmem:[%s2777_s7 + $0x88] sm:$0xff] }
 0x7a2   :  { %772 = vmatpush.msrb.mxu3 %v1622_v42 }
 0x7a7   :  { %v1752_v45 = vpop.eup %1751 }
 0x7a8   :  { %1618 = vmatmul.msk.f32.gmra.mxu0 %vm62_vm0, %v1752_v45  ;;  %v675_v49 = vsel %vm62_vm0, %v1752_v45, 0.0 }
 0x7a9   :  { %667 = vadd.xlane.f32.xlu0 %v666_v48  ;;  %676 = vadd.xlane.f32.xlu1 %v675_v49  ;;  %v1621_v48 = vld [vmem:[%s2777_s7 + $0x80] sm:$0xff] }
 0x7aa   :  { %773 = vmatpush.msrb.mxu3 %v1621_v48 }
 0x7b1   :  { %670 = vadd.xlane.f32.xlu1 %v669_v51 }
 0x80d   :  { %v654_v52 = vpop.f32.mrf.mxu0 }
 0x814   :  { %v674_v54 = vpop.xlane.xlu0 %673 }
 0x815   :  { %v657_v53 = vpop.f32.mrf.mxu0  ;;  %1753 = vrcp.f32 %v674_v54  ;;  %v1651_v54 = vld [vmem:[%s2778_s8 + $0x170] sm:$0xff] }
 0x81b   :  { %v1754_v60 = vpop.eup %1753 }
 0x81c   :  { %v677_v55 = vpop.xlane.xlu1 %676  ;;  %v668_v59 = vpop.xlane.xlu0 %667  ;;  %v684_v63 = vmul.f32 %v1754_v60, %v2111_v46  ;;  %v1649_v60 = vld [vmem:[%s2778_s8 + $0x160] sm:$0xff] }
 0x81d   :  { %1755 = vrcp.f32 %v677_v55  ;;  %v660_v56 = vpop.f32.mrf.mxu0 }
 0x81e   :  { %1757 = vrcp.f32 %v668_v59  ;;  %v688_v8 = vmul.f32 %v684_v63, %v660_v56  ;;  %v1650_v56 = vld [vmem:[%s2778_s8 + $0x168] sm:$0xff]  ;;  %v1647_v63 = vld [vmem:[%s2778_s8 + $0x150] sm:$0xff] }
 0x823   :  { %v1756_v62 = vpop.eup %1755 }
 0x824   :  { %v671_v0 = vpop.xlane.xlu1 %670  ;;  %v685_v3 = vmul.f32 %v1756_v62, %v2116_v47  ;;  %v1758_v9 = vpop.eup %1757  ;;  %v1648_v62 = vld [vmem:[%s2778_s8 + $0x158] sm:$0xff] }
 0x825   :  { %1759 = vrcp.f32 %v671_v0  ;;  %v663_v4 = vpop.f32.mrf.mxu0  ;;  %v682_v12 = vmul.f32 %v1758_v9, %v2128_v58  ;;  %v1646_v0 = vld [vmem:[%s2778_s8 + $0x148] sm:$0xff] }
 0x826   :  { %v689_v7 = vmul.f32 %v685_v3, %v663_v4  ;;  %v1645_v4 = vld [vmem:[%s2778_s8 + $0x140] sm:$0xff] }
 0x827   :  { %v686_v14 = vmul.f32 %v682_v12, %v654_v52  ;;  %v1642_v12 = vld [vmem:[%s2778_s8 + $0x128] sm:$0xff] }
 0x828   :  { %705 = vmatpush.msra.mxu2 %v689_v7 }
 0x82a   :  { %706 = vmatpush.msra.mxu2 %v688_v8  ;;  %v1644_v8 = vld [vmem:[%s2778_s8 + $0x138] sm:$0xff] }
 0x82b   :  { %v1760_v10 = vpop.eup %1759 }
 0x82c   :  { %v683_v11 = vmul.f32 %v1760_v10, %v2123_v57  ;;  %v1643_v10 = vld [vmem:[%s2778_s8 + $0x130] sm:$0xff] }
 0x82e   :  { %v687_v13 = vmul.f32 %v683_v11, %v657_v53  ;;  %v1652_v53 = vld [vmem:[%s2778_s8 + $0x178] sm:$0xff] }
 0x82f   :  { %795 = vmatpush.msra.mxu1 %v1652_v53 }
 0x830   :  { %707 = vmatpush.msra.mxu2 %v687_v13 }
 0x831   :  { %796 = vmatpush.msra.mxu1 %v1651_v54 }
 0x832   :  { %708 = vmatpush.msra.mxu2 %v686_v14  ;;  %v1641_v14 = vld [vmem:[%s2778_s8 + $0x120] sm:$0xff] }
 0x833   :  { %1620 = vmatmul.msk.f32.vlgmr.msra.gmra.mxu2 %vm369_vm6, %v2135_v1  ;;  %797 = vmatpush.msra.mxu1 %v1650_v56 }
 0x835   :  { %798 = vmatpush.msra.mxu1 %v1649_v60 }
 0x837   :  { %799 = vmatpush.msra.mxu1 %v1648_v62 }
 0x839   :  { %800 = vmatpush.msra.mxu1 %v1647_v63 }
 0x83b   :  { %801 = vmatpush.msra.mxu1 %v1646_v0 }
 0x83d   :  { %802 = vmatpush.msra.mxu1 %v1645_v4 }
 0x83f   :  { %803 = vmatpush.msra.mxu1 %v1644_v8 }
 0x841   :  { %804 = vmatpush.msra.mxu1 %v1643_v10 }
 0x843   :  { %805 = vmatpush.msra.mxu1 %v1642_v12 }
 0x845   :  { %806 = vmatpush.msra.mxu1 %v1641_v14 }
 0x847   :  { %807 = vmatpush.msra.mxu1 %v1640_v5 }
 0x849   :  { %808 = vmatpush.msra.mxu1 %v1639_v30 }
 0x8b6   :  { %v710_v17 = vpop.f32.mrf.mxu2 }
 0x8b7   :  { %v2307_v18 = vadd.f32 %v710_v17, %v692_v16  ;;  %v736_v17 = vperm.slane %v2304_v15, 1  ;;  %v1637_v15 = vld [vmem:[%s2778_s8 + $0x100] sm:$0xff] }
 0x8b9   :  { %713 = vadd.xlane.f32.xlu1 %v2307_v18  ;;  %v716_v19 = vmul.f32 %v2307_v18, %v2307_v18 }
 0x8bb   :  { %717 = vadd.xlane.f32.xlu0 %v716_v19 }
 0x92c   :  { %v714_v41 = vpop.xlane.xlu1 %713 }
 0x92d   :  { %v715_v44 = vmul.f32 %v714_v41, %v2189_v35 }
 0x92e   :  { %v718_v45 = vpop.xlane.xlu0 %717 }
 0x92f   :  { %v720_v49 = vmul.f32 %v715_v44, %v715_v44  ;;  %v719_v51 = vmul.f32 %v718_v45, %v2189_v35  ;;  %v723_v19 = vsub.f32 %v2307_v18, %v715_v44  ;;  %v1638_v18 = vld [vmem:[%s2778_s8 + $0x108] sm:$0xff] }
 0x930   :  { %809 = vmatpush.msra.mxu1 %v1638_v18 }
 0x931   :  { %v721_v52 = vsub.f32 %v719_v51, %v720_v49 }
 0x932   :  { %810 = vmatpush.msra.mxu1 %v1637_v15 }
 0x933   :  { %v722_v55 = vmax.f32 %v721_v52, 0.0 }
 0x935   :  { %v724_v59 = vadd.f32 1e-05, %v722_v55 }
 0x937   :  { %1761 = vrsqrt.f32 %v724_v59  ;;  %vm731_vm2 = vweird.f32 %v724_v59 }
 0x93d   :  { %v1762_v3 = vpop.eup %1761 }
 0x93e   :  { %v726_v7 = vmul.f32 %v1762_v3, %v724_v59  ;;  %vm732_vm15 = vweird.f32 %v1762_v3 }
 0x93f   :  { %vm733_vm3 = vmor %vm731_vm2, %vm732_vm15 }
 0x940   :  { %v727_v9 = vmul.f32 %v1762_v3, %v726_v7 }
 0x942   :  { %v728_v11 = vmul.f32 0.5, %v727_v9 }
 0x944   :  { %v729_v13 = vsub.f32 1.5, %v728_v11 }
 0x946   :  { %v730_v16 = vmul.f32 %v1762_v3, %v729_v13 }
 0x948   :  { %v734_v20 = vsel %vm733_vm3, %v1762_v3, %v730_v16 }
 0x949   :  { %v735_v2 = vmul.f32 %v734_v20, %v723_v19 }
 0x94b   :  { %v737_v31 = vmul.f32 %v736_v17, %v735_v2 }
 0x94d   :  { %v739_v32 = vadd.f32 %v738_v26, %v737_v31 }
 0x94f   :  { %v740_v33 = vmax.f32 %v739_v32, 0.0 }
 0x951   :  { %774 = vmatmul.f32.vlgmr.msrb.gmra.mxu3 %v740_v33 }
 0x9d4   :  { %v775_v34 = vpop.f32.mrf.mxu3 }
 0x9d5   :  { %811 = vmatmul.f32.vlgmr.msra.gmra.mxu1 %v775_v34 }
 0x9d6   :  { %966 = vmatpush.msrb.mxu1 %v775_v34 }
 0xa52   :  { %v812_v36 = vpop.f32.mrf.mxu1 }
 0xa53   :  { %847 = vrot.lane.b32.xlu1 %v812_v36, %s1871_s15  ;;  %1653 = vmatpush.xpose.msk.msrb.mxu2 %vm165_vm1, %v812_v36 }
 0xa56   :  { %1654 = vmatmul.msk.f32.vlgmr.msrb.gmra.mxu2 %vm165_vm1, %v2041_v25 }
 0xa5e   :  { %1655 = vmatmul.msk.f32.gmra.mxu2 %vm165_vm1, %v2050_v27 }
 0xa66   :  { %1656 = vmatmul.msk.f32.gmra.mxu2 %vm165_vm1, %v2065_v28 }
 0xa6e   :  { %1657 = vmatmul.msk.f32.gmra.mxu2 %vm165_vm1, %v2072_v29 }
 0xac5   :  { %v848_v37 = vpop.permute.xlu1 %847 }
 0xac6   :  { %865 = vmatpush.msra.mxu3 %v848_v37 }
 0xac7   :  { %1658 = vmatmul.msk.f32.vlgmr.msra.gmra.mxu3 %vm62_vm0, %v2015_v21 }
 0xacf   :  { %1659 = vmatmul.msk.f32.gmra.mxu3 %vm62_vm0, %v2022_v22 }
 0xad7   :  { %1660 = vmatmul.msk.f32.gmra.mxu3 %vm62_vm0, %v2029_v23 }
 0xad9   :  { %v835_v48 = vpop.f32.mrf.mxu2 }
 0xadf   :  { %1661 = vmatmul.msk.f32.gmra.mxu3 %vm62_vm0, %v2036_v24 }
 0xae1   :  { %v838_v52 = vpop.f32.mrf.mxu2 }
 0xb4a   :  { %v867_v38 = vpop.f32.mrf.mxu3 }
 0xb4b   :  { %v879_v39 = vmul.f32 %v867_v38, %v2041_v25 }
 0xb4d   :  { %v883_v40 = vsel %vm165_vm1, %v879_v39, 0.0 }
 0xb4e   :  { %884 = vadd.xlane.f32.xlu0 %v883_v40 }
 0xb52   :  { %v870_v41 = vpop.f32.mrf.mxu3 }
 0xb53   :  { %v880_v42 = vmul.f32 %v870_v41, %v2050_v27 }
 0xb55   :  { %v886_v21 = vsel %vm165_vm1, %v880_v42, 0.0 }
 0xb56   :  { %887 = vadd.xlane.f32.xlu2 %v886_v21 }
 0xb5a   :  { %v873_v44 = vpop.f32.mrf.mxu3 }
 0xb5b   :  { %v881_v22 = vmul.f32 %v873_v44, %v2065_v28 }
 0xb5d   :  { %v889_v23 = vsel %vm165_vm1, %v881_v22, 0.0 }
 0xb5e   :  { %890 = vadd.xlane.f32.xlu0 %v889_v23 }
 0xb62   :  { %v876_v45 = vpop.f32.mrf.mxu3 }
 0xb63   :  { %v882_v24 = vmul.f32 %v876_v45, %v2072_v29  ;;  %v841_v29 = vpop.f32.mrf.mxu2 }
 0xb65   :  { %v892_v25 = vsel %vm165_vm1, %v882_v24, 0.0 }
 0xb66   :  { %893 = vadd.xlane.f32.xlu2 %v892_v25 }
 0xb6b   :  { %v844_v8 = vpop.f32.mrf.mxu2 }
 0xbc1   :  { %v885_v49 = vpop.xlane.xlu0 %884 }
 0xbc2   :  { %v895_v51 = vadd.f32 %v885_v49, %v835_v48 }
 0xbc4   :  { %vm899_vm4 = vcmp.gt.f32.partialorder %v895_v51, 0.0  ;;  %v903_v27 = vmul.f32 0.2, %v895_v51 }
 0xbc6   :  { %v907_v53 = vsel %vm899_vm4, %v895_v51, %v903_v27 }
 0xbc7   :  { %v911_v54 = vadd.f32 %v907_v53, %v2084_v43 }
 0xbc9   :  { %v888_v55 = vpop.xlane.xlu2 %887  ;;  %v915_v28 = vsel %vm62_vm0, %v911_v54, -inf }
 0xbca   :  { %v896_v56 = vadd.f32 %v888_v55, %v838_v52  ;;  %916 = vmax.xlane.f32.xlu0 %v915_v28 }
 0xbcc   :  { %vm900_vm5 = vcmp.gt.f32.partialorder %v896_v56, 0.0  ;;  %v904_v59 = vmul.f32 0.2, %v896_v56 }
 0xbce   :  { %v908_v60 = vsel %vm900_vm5, %v896_v56, %v904_v59 }
 0xbcf   :  { %v912_v62 = vadd.f32 %v908_v60, %v2087_v50 }
 0xbd1   :  { %v891_v63 = vpop.xlane.xlu0 %890  ;;  %v918_v0 = vsel %vm62_vm0, %v912_v62, -inf }
 0xbd2   :  { %v897_v3 = vadd.f32 %v891_v63, %v841_v29  ;;  %919 = vmax.xlane.f32.xlu1 %v918_v0 }
 0xbd4   :  { %vm901_vm7 = vcmp.gt.f32.partialorder %v897_v3, 0.0  ;;  %v905_v4 = vmul.f32 0.2, %v897_v3 }
 0xbd6   :  { %v909_v7 = vsel %vm901_vm7, %v897_v3, %v905_v4  ;;  %v1681_v3 = vld [vmem:[%s2777_s7 + $0x168] sm:$0xff]  ;;  %v1680_v4 = vld [vmem:[%s2777_s7 + $0x160] sm:$0xff] }
 0xbd7   :  { %v913_v9 = vadd.f32 %v909_v7, %v2092_v61  ;;  %v1679_v7 = vld [vmem:[%s2777_s7 + $0x158] sm:$0xff] }
 0xbd9   :  { %v894_v10 = vpop.xlane.xlu2 %893  ;;  %v921_v11 = vsel %vm62_vm0, %v913_v9, -inf }
 0xbda   :  { %v898_v12 = vadd.f32 %v894_v10, %v844_v8  ;;  %922 = vmax.xlane.f32.xlu2 %v921_v11  ;;  %v1678_v8 = vld [vmem:[%s2777_s7 + $0x150] sm:$0xff]  ;;  %v1676_v10 = vld [vmem:[%s2777_s7 + $0x140] sm:$0xff]  ;;  %v1675_v11 = vld [vmem:[%s2777_s7 + $0x138] sm:$0xff] }
 0xbdc   :  { %vm902_vm8 = vcmp.gt.f32.partialorder %v898_v12, 0.0  ;;  %v906_v13 = vmul.f32 0.2, %v898_v12 }
 0xbde   :  { %v910_v14 = vsel %vm902_vm8, %v898_v12, %v906_v13  ;;  %v1674_v12 = vld [vmem:[%s2777_s7 + $0x130] sm:$0xff]  ;;  %v1673_v13 = vld [vmem:[%s2777_s7 + $0x128] sm:$0xff] }
 0xbdf   :  { %v914_v16 = vadd.f32 %v910_v14, %v2096_v6  ;;  %v1672_v14 = vld [vmem:[%s2777_s7 + $0x120] sm:$0xff] }
 0xbe1   :  { %v924_v17 = vsel %vm62_vm0, %v914_v16, -inf }
 0xbe2   :  { %925 = vmax.xlane.f32.xlu0 %v924_v17  ;;  %v1670_v17 = vld [vmem:[%s2777_s7 + $0x110] sm:$0xff] }
 0xc3d   :  { %v917_v19 = vpop.xlane.xlu0 %916 }
 0xc3e   :  { %v927_v5 = vsub.f32 %v911_v54, %v917_v19 }
 0xc40   :  { %v931_v20 = vmul.f32 1.442695, %v927_v5  ;;  %v1669_v5 = vld [vmem:[%s2777_s7 + $0x108] sm:$0xff] }
 0xc42   :  { %1763 = vpow2.f32 %v931_v20 }
 0xc45   :  { %v920_v26 = vpop.xlane.xlu1 %919 }
 0xc46   :  { %v928_v2 = vsub.f32 %v912_v62, %v920_v26 }
 0xc48   :  { %v1764_v30 = vpop.eup %1763  ;;  %v933_v31 = vmul.f32 1.442695, %v928_v2  ;;  %v1668_v2 = vld [vmem:[%s2777_s7 + $0x100] sm:$0xff] }
 0xc49   :  { %1662 = vmatmul.msk.f32.vlgmr.msrb.gmra.mxu1 %vm62_vm0, %v1764_v30  ;;  %v980_v41 = vsel %vm62_vm0, %v1764_v30, 0.0 }
 0xc4a   :  { %1765 = vpow2.f32 %v933_v31 }
 0xc4d   :  { %v923_v18 = vpop.xlane.xlu2 %922 }
 0xc4e   :  { %v929_v32 = vsub.f32 %v913_v9, %v923_v18  ;;  %v1677_v9 = vld [vmem:[%s2777_s7 + $0x148] sm:$0xff] }
 0xc50   :  { %v1766_v33 = vpop.eup %1765  ;;  %v935_v15 = vmul.f32 1.442695, %v929_v32  ;;  %v1699_v32 = vld [vmem:[%s2778_s8 + $0x1f8] sm:$0xff] }
 0xc51   :  { %1663 = vmatmul.msk.f32.gmra.mxu1 %vm62_vm0, %v1766_v33  ;;  %v983_v21 = vsel %vm62_vm0, %v1766_v33, 0.0  ;;  %v1698_v33 = vld [vmem:[%s2778_s8 + $0x1f0] sm:$0xff]  ;;  %1109 = vmatpush.msrb.mxu3 %v1699_v32 }
 0xc52   :  { %1767 = vpow2.f32 %v935_v15 }
 0xc53   :  { %1110 = vmatpush.msrb.mxu3 %v1698_v33 }
 0xc55   :  { %v926_v34 = vpop.xlane.xlu0 %925 }
 0xc56   :  { %v930_v36 = vsub.f32 %v914_v16, %v926_v34  ;;  %v1671_v16 = vld [vmem:[%s2777_s7 + $0x118] sm:$0xff]  ;;  %v1697_v34 = vld [vmem:[%s2778_s8 + $0x1e8] sm:$0xff] }
 0xc57   :  { %1111 = vmatpush.msrb.mxu3 %v1697_v34 }
 0xc58   :  { %v1768_v37 = vpop.eup %1767  ;;  %v937_v38 = vmul.f32 1.442695, %v930_v36 }
 0xc59   :  { %1664 = vmatmul.msk.f32.gmra.mxu1 %vm62_vm0, %v1768_v37  ;;  %v986_v39 = vsel %vm62_vm0, %v1768_v37, 0.0  ;;  %v1696_v37 = vld [vmem:[%s2778_s8 + $0x1e0] sm:$0xff] }
 0xc5a   :  { %1769 = vpow2.f32 %v937_v38  ;;  %987 = vadd.xlane.f32.xlu0 %v986_v39  ;;  %v1695_v38 = vld [vmem:[%s2778_s8 + $0x1d8] sm:$0xff]  ;;  %1112 = vmatpush.msrb.mxu3 %v1696_v37  ;;  %v1694_v39 = vld [vmem:[%s2778_s8 + $0x1d0] sm:$0xff] }
 0xc5c   :  { %1113 = vmatpush.msrb.mxu3 %v1695_v38 }
 0xc5e   :  { %1114 = vmatpush.msrb.mxu3 %v1694_v39 }
 0xc60   :  { %v1770_v40 = vpop.eup %1769 }
 0xc61   :  { %1665 = vmatmul.msk.f32.gmra.mxu1 %vm62_vm0, %v1770_v40  ;;  %v989_v42 = vsel %vm62_vm0, %v1770_v40, 0.0  ;;  %v1693_v40 = vld [vmem:[%s2778_s8 + $0x1c8] sm:$0xff] }
 0xc62   :  { %981 = vadd.xlane.f32.xlu0 %v980_v41  ;;  %990 = vadd.xlane.f32.xlu2 %v989_v42  ;;  %v1692_v42 = vld [vmem:[%s2778_s8 + $0x1c0] sm:$0xff] }
 0xc63   :  { %1115 = vmatpush.msrb.mxu3 %v1693_v40 }
 0xc65   :  { %1116 = vmatpush.msrb.mxu3 %v1692_v42 }
 0xc6a   :  { %984 = vadd.xlane.f32.xlu2 %v983_v21 }
 0xcc6   :  { %v968_v44 = vpop.f32.mrf.mxu1 }
 0xccd   :  { %v988_v23 = vpop.xlane.xlu0 %987 }
 0xcce   :  { %v971_v22 = vpop.f32.mrf.mxu1  ;;  %1771 = vrcp.f32 %v988_v23  ;;  %v1690_v23 = vld [vmem:[%s2778_s8 + $0x1b0] sm:$0xff] }
 0xcd4   :  { %v1772_v48 = vpop.eup %1771 }
 0xcd5   :  { %v991_v45 = vpop.xlane.xlu2 %990  ;;  %v982_v25 = vpop.xlane.xlu0 %981  ;;  %v998_v51 = vmul.f32 %v1772_v48, %v2111_v46  ;;  %v2464_v46 = vld [vmem:[%s2779_s9 + $0x8] sm:$0x7]  ;;  %v1688_v48 = vld [vmem:[%s2778_s8 + $0x1a0] sm:$0xff] }
 0xcd6   :  { %1773 = vrcp.f32 %v991_v45  ;;  %v974_v24 = vpop.f32.mrf.mxu1 }
 0xcd7   :  { %1775 = vrcp.f32 %v982_v25  ;;  %v1002_v55 = vmul.f32 %v998_v51, %v974_v24  ;;  %v1689_v24 = vld [vmem:[%s2778_s8 + $0x1a8] sm:$0xff]  ;;  %v1050_v51 = vperm.slane %v2464_v46, 1 }
 0xcdc   :  { %v1774_v49 = vpop.eup %1773 }
 0xcdd   :  { %v985_v52 = vpop.xlane.xlu2 %984  ;;  %v999_v27 = vmul.f32 %v1774_v49, %v2116_v47  ;;  %v1776_v28 = vpop.eup %1775  ;;  %v1006_v47 = vperm.slane %v2464_v46, 0 }
 0xcde   :  { %1777 = vrcp.f32 %v985_v52  ;;  %v977_v53 = vpop.f32.mrf.mxu1  ;;  %v996_v29 = vmul.f32 %v1776_v28, %v2128_v58  ;;  %v1683_v58 = vld [vmem:[%s2777_s7 + $0x178] sm:$0xff]  ;;  %v1686_v28 = vld [vmem:[%s2778_s8 + $0x190] sm:$0xff] }
 0xcdf   :  { %v1003_v54 = vmul.f32 %v999_v27, %v977_v53  ;;  %1072 = vmatpush.msra.mxu2 %v1683_v58  ;;  %v1687_v27 = vld [vmem:[%s2778_s8 + $0x198] sm:$0xff] }
 0xce0   :  { %v1000_v62 = vmul.f32 %v996_v29, %v968_v44  ;;  %v1691_v44 = vld [vmem:[%s2778_s8 + $0x1b8] sm:$0xff] }
 0xce1   :  { %1019 = vmatpush.msrb.mxu0 %v1003_v54  ;;  %1117 = vmatpush.msrb.mxu3 %v1691_v44  ;;  %v1052_v54 = vperm.slane %v2464_v46, 2  ;;  %v1808_v58 = vld [vmem:[%s2772_s2 + $0x18] sm:$0xff] }
 0xce3   :  { %1020 = vmatpush.msrb.mxu0 %v1002_v55  ;;  %1118 = vmatpush.msrb.mxu3 %v1690_v23 }
 0xce4   :  { %v1778_v56 = vpop.eup %1777 }
 0xce5   :  { %v997_v59 = vmul.f32 %v1778_v56, %v2123_v57  ;;  %1119 = vmatpush.msrb.mxu3 %v1689_v24 }
 0xce7   :  { %v1001_v60 = vmul.f32 %v997_v59, %v971_v22  ;;  %1120 = vmatpush.msrb.mxu3 %v1688_v48  ;;  %v1685_v59 = vld [vmem:[%s2778_s8 + $0x188] sm:$0xff] }
 0xce9   :  { %1021 = vmatpush.msrb.mxu0 %v1001_v60  ;;  %1121 = vmatpush.msrb.mxu3 %v1687_v27 }
 0xceb   :  { %1022 = vmatpush.msrb.mxu0 %v1000_v62  ;;  %1122 = vmatpush.msrb.mxu3 %v1686_v28  ;;  %v1684_v62 = vld [vmem:[%s2778_s8 + $0x180] sm:$0xff] }
 0xcec   :  { %1667 = vmatmul.msk.f32.vlgmr.msrb.gmra.mxu0 %vm369_vm6, %v2135_v1  ;;  %v1682_v1 = vld [vmem:[%s2777_s7 + $0x170] sm:$0xff] }
 0xced   :  { %1073 = vmatpush.msra.mxu2 %v1682_v1  ;;  %1123 = vmatpush.msrb.mxu3 %v1685_v59 }
 0xcef   :  { %1074 = vmatpush.msra.mxu2 %v1681_v3  ;;  %1124 = vmatpush.msrb.mxu3 %v1684_v62  ;;  %v1809_v3 = vld [vmem:[%s2773_s3] sm:$0xff] }
 0xcf1   :  { %1075 = vmatpush.msra.mxu2 %v1680_v4  ;;  %v1810_v4 = vld [vmem:[%s2773_s3 + $0x8] sm:$0xff] }
 0xcf3   :  { %1076 = vmatpush.msra.mxu2 %v1679_v7  ;;  %v1811_v7 = vld [vmem:[%s2773_s3 + $0x10] sm:$0xff] }
 0xcf5   :  { %1077 = vmatpush.msra.mxu2 %v1678_v8  ;;  %v1812_v8 = vld [vmem:[%s2773_s3 + $0x18] sm:$0xff] }
 0xcf7   :  { %1078 = vmatpush.msra.mxu2 %v1677_v9 }
 0xcf9   :  { %1079 = vmatpush.msra.mxu2 %v1676_v10 }
 0xcfb   :  { %1080 = vmatpush.msra.mxu2 %v1675_v11 }
 0xcfd   :  { %1081 = vmatpush.msra.mxu2 %v1674_v12 }
 0xcff   :  { %1082 = vmatpush.msra.mxu2 %v1673_v13 }
 0xd01   :  { %1083 = vmatpush.msra.mxu2 %v1672_v14 }
 0xd03   :  { %1084 = vmatpush.msra.mxu2 %v1671_v16 }
 0xd05   :  { %1085 = vmatpush.msra.mxu2 %v1670_v17 }
 0xd07   :  { %1086 = vmatpush.msra.mxu2 %v1669_v5 }
 0xd09   :  { %1087 = vmatpush.msra.mxu2 %v1668_v2 }
 0xd69   :  { %v1024_v63 = vpop.f32.mrf.mxu0 }
 0xd6a   :  { %v2467_v0 = vadd.f32 %v1024_v63, %v1006_v47  ;;  %v1805_v63 = vld [vmem:[%s2772_s2] sm:$0xff] }
 0xd6c   :  { %1027 = vadd.xlane.f32.xlu2 %v2467_v0  ;;  %v1030_v57 = vmul.f32 %v2467_v0, %v2467_v0 }
 0xd6e   :  { %1031 = vadd.xlane.f32.xlu0 %v1030_v57  ;;  %v1807_v57 = vld [vmem:[%s2772_s2 + $0x10] sm:$0xff] }
 0xddf   :  { %v1028_v19 = vpop.xlane.xlu2 %1027 }
 0xde0   :  { %v1029_v20 = vmul.f32 %v1028_v19, %v2189_v35 }
 0xde1   :  { %v1032_v26 = vpop.xlane.xlu0 %1031 }
 0xde2   :  { %v1034_v30 = vmul.f32 %v1029_v20, %v1029_v20  ;;  %v1033_v31 = vmul.f32 %v1032_v26, %v2189_v35  ;;  %v1037_v52 = vsub.f32 %v2467_v0, %v1029_v20  ;;  %v1806_v0 = vld [vmem:[%s2772_s2 + $0x8] sm:$0xff] }
 0xde4   :  { %v1035_v18 = vsub.f32 %v1033_v31, %v1034_v30 }
 0xde6   :  { %v1036_v15 = vmax.f32 %v1035_v18, 0.0 }
 0xde8   :  { %v1038_v36 = vadd.f32 1e-05, %v1036_v15 }
 0xdea   :  { %1779 = vrsqrt.f32 %v1038_v36  ;;  %vm1045_vm10 = vweird.f32 %v1038_v36 }
 0xdf0   :  { %v1780_v41 = vpop.eup %1779 }
 0xdf1   :  { %v1040_v21 = vmul.f32 %v1780_v41, %v1038_v36  ;;  %vm1046_vm9 = vweird.f32 %v1780_v41 }
 0xdf2   :  { %vm1047_vm11 = vmor %vm1045_vm10, %vm1046_vm9 }
 0xdf3   :  { %v1041_v22 = vmul.f32 %v1780_v41, %v1040_v21 }
 0xdf5   :  { %v1042_v45 = vmul.f32 0.5, %v1041_v22 }
 0xdf7   :  { %v1043_v25 = vsub.f32 1.5, %v1042_v45 }
 0xdf9   :  { %v1044_v49 = vmul.f32 %v1780_v41, %v1043_v25 }
 0xdfb   :  { %v1048_v53 = vsel %vm1047_vm11, %v1780_v41, %v1044_v49 }
 0xdfc   :  { %v1049_v55 = vmul.f32 %v1048_v53, %v1037_v52 }
 0xdfe   :  { %v1051_v56 = vmul.f32 %v1050_v51, %v1049_v55 }
 0xe00   :  { %v1053_v29 = vadd.f32 %v1052_v54, %v1051_v56 }
 0xe02   :  { %v1054_v60 = vmax.f32 %v1053_v29, 0.0 }
 0xe04   :  { %1088 = vmatmul.f32.vlgmr.msra.gmra.mxu2 %v1054_v60 }
 0xe87   :  { %v1089_v46 = vpop.f32.mrf.mxu2 }
 0xe88   :  { %1125 = vmatmul.f32.vlgmr.msrb.gmra.mxu3 %v1089_v46  ;;  %1280 = vmatpush.msra.mxu1 %v1089_v46 }
 0xf0b   :  { %v1126_v47 = vpop.f32.mrf.mxu3 }
 0xf0c   :  { %1161 = vrot.lane.b32.xlu2 %v1126_v47, %s1871_s15  ;;  %1700 = vmatpush.xpose.msk.msra.mxu0 %vm165_vm1, %v1126_v47 }
 0xf0f   :  { %1701 = vmatmul.msk.f32.vlgmr.msra.gmra.mxu0 %vm165_vm1, %v1805_v63 }
 0xf17   :  { %1702 = vmatmul.msk.f32.gmra.mxu0 %vm165_vm1, %v1806_v0 }
 0xf1f   :  { %1703 = vmatmul.msk.f32.gmra.mxu0 %vm165_vm1, %v1807_v57 }
 0xf27   :  { %1704 = vmatmul.msk.f32.gmra.mxu0 %vm165_vm1, %v1808_v58 }
 0xf66   :  { %v1162_v1 = vpop.permute.xlu2 %1161 }
 0xf67   :  { %1179 = vmatpush.msrb.mxu2 %v1162_v1 }
 0xf68   :  { %1705 = vmatmul.msk.f32.vlgmr.msrb.gmra.mxu2 %vm62_vm0, %v1809_v3 }
 0xf70   :  { %1706 = vmatmul.msk.f32.gmra.mxu2 %vm62_vm0, %v1810_v4 }
 0xf78   :  { %1707 = vmatmul.msk.f32.gmra.mxu2 %vm62_vm0, %v1811_v7 }
 0xf80   :  { %1708 = vmatmul.msk.f32.gmra.mxu2 %vm62_vm0, %v1812_v8 }
 0xf8c   :  { %v1149_v2 = vpop.f32.mrf.mxu0 }
 0xf94   :  { %v1152_v18 = vpop.f32.mrf.mxu0 }
 0xf9c   :  { %v1155_v39 = vpop.f32.mrf.mxu0 }
 0xfeb   :  { %v1181_v9 = vpop.f32.mrf.mxu2 }
 0xfec   :  { %v1193_v10 = vmul.f32 %v1805_v63, %v1181_v9 }
 0xfee   :  { %v1197_v11 = vsel %vm165_vm1, %v1193_v10, 0.0 }
 0xfef   :  { %1198 = vadd.xlane.f32.xlu0 %v1197_v11 }
 0xff3   :  { %v1184_v12 = vpop.f32.mrf.mxu2 }
 0xff4   :  { %v1194_v13 = vmul.f32 %v1806_v0, %v1184_v12 }
 0xff6   :  { %v1200_v14 = vsel %vm165_vm1, %v1194_v13, 0.0 }
 0xff7   :  { %1201 = vadd.xlane.f32.xlu0 %v1200_v14  ;;  %v1813_v14 = vld [vmem:[%s2775_s5 + $0x10] sm:$0xff] }
 0xffb   :  { %v1187_v16 = vpop.f32.mrf.mxu2 }
 0xffc   :  { %v1195_v17 = vmul.f32 %v1807_v57, %v1187_v16 }
 0xffe   :  { %v1203_v19 = vsel %vm165_vm1, %v1195_v17, 0.0 }
 0xfff   :  { %1204 = vadd.xlane.f32.xlu1 %v1203_v19  ;;  %v1814_v19 = vld [vmem:[%s2775_s5 + $0x18] sm:$0xff] }
0x1003   :  { %v1190_v5 = vpop.f32.mrf.mxu2 }
0x1004   :  { %v1196_v20 = vmul.f32 %v1808_v58, %v1190_v5 }
0x1006   :  { %v1206_v26 = vsel %vm165_vm1, %v1196_v20, 0.0 }
0x1007   :  { %1207 = vadd.xlane.f32.xlu0 %v1206_v26 }
0x1062   :  { %v1199_v30 = vpop.xlane.xlu0 %1198 }
0x1063   :  { %v1209_v31 = vadd.f32 %v1199_v30, %v1149_v2 }
0x1065   :  { %vm1213_vm12 = vcmp.gt.f32.partialorder %v1209_v31, 0.0  ;;  %v1217_v32 = vmul.f32 0.2, %v1209_v31 }
0x1067   :  { %v1221_v33 = vsel %vm1213_vm12, %v1209_v31, %v1217_v32 }
0x1068   :  { %v1225_v15 = vadd.f32 %v1221_v33, %v2084_v43  ;;  %v1158_v43 = vpop.f32.mrf.mxu0  ;;  %v1816_v33 = vld [vmem:[%s2775_s5] sm:$0xff] }
0x106a   :  { %v1202_v34 = vpop.xlane.xlu0 %1201  ;;  %v1229_v36 = vsel %vm62_vm0, %v1225_v15, -inf }
0x106b   :  { %v1210_v37 = vadd.f32 %v1202_v34, %v1152_v18  ;;  %1230 = vmax.xlane.f32.xlu1 %v1229_v36  ;;  %v1815_v18 = vld [vmem:[%s2775_s5 + $0x8] sm:$0xff] }
0x106d   :  { %vm1214_vm13 = vcmp.gt.f32.partialorder %v1210_v37, 0.0  ;;  %v1218_v38 = vmul.f32 0.2, %v1210_v37 }
0x106f   :  { %v1222_v40 = vsel %vm1214_vm13, %v1210_v37, %v1218_v38  ;;  %v1817_v37 = vld [vmem:[%s2774_s4] sm:$0xff]  ;;  %v2646_v38 = vld [vmem:[%s2779_s9 + $0xc] sm:$0x7] }
0x1070   :  { %v1226_v41 = vadd.f32 %v1222_v40, %v2087_v50 }
0x1072   :  { %v1205_v42 = vpop.xlane.xlu1 %1204  ;;  %v1232_v21 = vsel %vm62_vm0, %v1226_v41, -inf }
0x1073   :  { %v1211_v44 = vadd.f32 %v1205_v42, %v1155_v39  ;;  %1233 = vmax.xlane.f32.xlu2 %v1232_v21  ;;  %v1320_v39 = vperm.slane %v2646_v38, 0  ;;  %v1384_v21 = vld [vmem:[%s2780_s10 + $0x78] sm:$0xff] }
0x1074   :  { %1385 = vmatpush.msrb.mxu0 %v1384_v21 }
0x1075   :  { %vm1215_vm1 = vcmp.gt.f32.partialorder %v1211_v44, 0.0  ;;  %v1219_v22 = vmul.f32 0.2, %v1211_v44 }
0x1077   :  { %v1223_v23 = vsel %vm1215_vm1, %v1211_v44, %v1219_v22  ;;  %v1383_v44 = vld [vmem:[%s2780_s10 + $0x70] sm:$0xff]  ;;  %v1382_v22 = vld [vmem:[%s2780_s10 + $0x68] sm:$0xff] }
0x1078   :  { %v1227_v45 = vadd.f32 %v1223_v23, %v2092_v61  ;;  %1386 = vmatpush.msrb.mxu0 %v1383_v44  ;;  %v1381_v23 = vld [vmem:[%s2780_s10 + $0x60] sm:$0xff] }
0x107a   :  { %v1208_v24 = vpop.xlane.xlu0 %1207  ;;  %v1235_v25 = vsel %vm62_vm0, %v1227_v45, -inf  ;;  %1387 = vmatpush.msrb.mxu0 %v1382_v22 }
0x107b   :  { %v1212_v48 = vadd.f32 %v1208_v24, %v1158_v43  ;;  %1236 = vmax.xlane.f32.xlu0 %v1235_v25  ;;  %v1380_v43 = vld [vmem:[%s2780_s10 + $0x58] sm:$0xff]  ;;  %v1378_v24 = vld [vmem:[%s2780_s10 + $0x48] sm:$0xff]  ;;  %v1377_v25 = vld [vmem:[%s2780_s10 + $0x40] sm:$0xff] }
0x107c   :  { %1388 = vmatpush.msrb.mxu0 %v1381_v23 }
0x107d   :  { %vm1216_vm14 = vcmp.gt.f32.partialorder %v1212_v48, 0.0  ;;  %v1220_v49 = vmul.f32 0.2, %v1212_v48 }
0x107e   :  { %1389 = vmatpush.msrb.mxu0 %v1380_v43 }
0x107f   :  { %v1224_v51 = vsel %vm1216_vm14, %v1212_v48, %v1220_v49  ;;  %v1376_v48 = vld [vmem:[%s2780_s10 + $0x38] sm:$0xff]  ;;  %v1375_v49 = vld [vmem:[%s2780_s10 + $0x30] sm:$0xff] }
0x1080   :  { %v1228_v50 = vadd.f32 %v1224_v51, %v2096_v6  ;;  %v1374_v51 = vld [vmem:[%s2780_s10 + $0x28] sm:$0xff] }
0x1082   :  { %v1238_v52 = vsel %vm62_vm0, %v1228_v50, -inf }
0x1083   :  { %1239 = vmax.xlane.f32.xlu1 %v1238_v52  ;;  %v1372_v52 = vld [vmem:[%s2780_s10 + $0x18] sm:$0xff] }
0x10de   :  { %v1231_v27 = vpop.xlane.xlu1 %1230 }
0x10df   :  { %v1241_v53 = vsub.f32 %v1225_v15, %v1231_v27  ;;  %v1371_v27 = vld [vmem:[%s2780_s10 + $0x10] sm:$0xff] }
0x10e1   :  { %v1245_v54 = vmul.f32 1.442695, %v1241_v53 }
0x10e3   :  { %1781 = vpow2.f32 %v1245_v54  ;;  %v1370_v54 = vld [vmem:[%s2780_s10 + $0x8] sm:$0xff] }
0x10e6   :  { %v1234_v55 = vpop.xlane.xlu2 %1233 }
0x10e7   :  { %v1242_v28 = vsub.f32 %v1226_v41, %v1234_v55 }
0x10e9   :  { %v1782_v61 = vpop.eup %1781  ;;  %v1247_v56 = vmul.f32 1.442695, %v1242_v28 }
0x10ea   :  { %1709 = vmatmul.msk.f32.vlgmr.msra.gmra.mxu1 %vm62_vm0, %v1782_v61  ;;  %v1294_v58 = vsel %vm62_vm0, %v1782_v61, 0.0  ;;  %v1369_v61 = vld [vmem:[%s2780_s10] sm:$0xff] }
0x10eb   :  { %1783 = vpow2.f32 %v1247_v56 }
0x10ee   :  { %v1237_v59 = vpop.xlane.xlu0 %1236 }
0x10ef   :  { %v1243_v29 = vsub.f32 %v1227_v45, %v1237_v59  ;;  %v1379_v45 = vld [vmem:[%s2780_s10 + $0x50] sm:$0xff] }
0x10f0   :  { %1390 = vmatpush.msrb.mxu0 %v1379_v45 }
0x10f1   :  { %v1784_v60 = vpop.eup %1783  ;;  %v1249_v62 = vmul.f32 1.442695, %v1243_v29 }
0x10f2   :  { %1710 = vmatmul.msk.f32.gmra.mxu1 %vm62_vm0, %v1784_v60  ;;  %v1297_v3 = vsel %vm62_vm0, %v1784_v60, 0.0  ;;  %1391 = vmatpush.msrb.mxu0 %v1378_v24  ;;  %v1420_v60 = vld [vmem:[%s2781_s11 + $0x78] sm:$0xff] }
0x10f3   :  { %1785 = vpow2.f32 %v1249_v62  ;;  %v1419_v62 = vld [vmem:[%s2781_s11 + $0x70] sm:$0xff]  ;;  %1421 = vmatpush.msra.mxu2 %v1420_v60 }
0x10f4   :  { %1392 = vmatpush.msrb.mxu0 %v1377_v25  ;;  %v1874_v25 = vmov 8.0  }
0x10f5   :  { %1422 = vmatpush.msra.mxu2 %v1419_v62 }
0x10f6   :  { %v1240_v6 = vpop.xlane.xlu1 %1239  ;;  %1393 = vmatpush.msrb.mxu0 %v1376_v48 }
0x10f7   :  { %v1244_v46 = vsub.f32 %v1228_v50, %v1240_v6  ;;  %v1373_v50 = vld [vmem:[%s2780_s10 + $0x20] sm:$0xff] }
0x10f8   :  { %1394 = vmatpush.msrb.mxu0 %v1375_v49 }
0x10f9   :  { %v1786_v47 = vpop.eup %1785  ;;  %v1251_v63 = vmul.f32 1.442695, %v1244_v46  ;;  %v1418_v46 = vld [vmem:[%s2781_s11 + $0x68] sm:$0xff] }
0x10fa   :  { %1711 = vmatmul.msk.f32.gmra.mxu1 %vm62_vm0, %v1786_v47  ;;  %v1300_v0 = vsel %vm62_vm0, %v1786_v47, 0.0  ;;  %1395 = vmatpush.msrb.mxu0 %v1374_v51 }
0x10fb   :  { %1787 = vpow2.f32 %v1251_v63  ;;  %1301 = vadd.xlane.f32.xlu1 %v1300_v0  ;;  %1423 = vmatpush.msra.mxu2 %v1418_v46  ;;  %v1416_v63 = vld [vmem:[%s2781_s11 + $0x58] sm:$0xff]  ;;  %v1415_v0 = vld [vmem:[%s2781_s11 + $0x50] sm:$0xff] }
0x10fc   :  { %1396 = vmatpush.msrb.mxu0 %v1373_v50  ;;  %v1724_v50 = vld [vmem:[%s2782_s12] ss:$0 sm:$0xff]  ;;  %s1876_s12 = smov [#allocation4]  }
0x10fd   :  { %s1555_s17 = sshll.u32 %s1876_s12, 4  ;;  %s1556_s17 = int_to_ptr.vmem [resolvable:$true] %s1555_s17 }
0x10fe   :  { %1397 = vmatpush.msrb.mxu0 %v1372_v52 }
0x1100   :  { %1398 = vmatpush.msrb.mxu0 %v1371_v27 }
0x1101   :  { %v1788_v57 = vpop.eup %1787 }
0x1102   :  { %1712 = vmatmul.msk.f32.gmra.mxu1 %vm62_vm0, %v1788_v57  ;;  %v1303_v1 = vsel %vm62_vm0, %v1788_v57, 0.0  ;;  %1399 = vmatpush.msrb.mxu0 %v1370_v54  ;;  %v1414_v57 = vld [vmem:[%s2781_s11 + $0x48] sm:$0xff] }
0x1103   :  { %1295 = vadd.xlane.f32.xlu1 %v1294_v58  ;;  %1304 = vadd.xlane.f32.xlu0 %v1303_v1  ;;  %v1413_v1 = vld [vmem:[%s2781_s11 + $0x40] sm:$0xff] }
0x1104   :  { %1400 = vmatpush.msrb.mxu0 %v1369_v61 }
0x110b   :  { %1298 = vadd.xlane.f32.xlu0 %v1297_v3 }
0x1167   :  { %v1282_v4 = vpop.f32.mrf.mxu1 }
0x116e   :  { %v1302_v8 = vpop.xlane.xlu1 %1301 }
0x116f   :  { %v1285_v7 = vpop.f32.mrf.mxu1  ;;  %1789 = vrcp.f32 %v1302_v8  ;;  %v1411_v8 = vld [vmem:[%s2781_s11 + $0x30] sm:$0xff] }
0x1175   :  { %v1790_v12 = vpop.eup %1789 }
0x1176   :  { %v1305_v9 = vpop.xlane.xlu0 %1304  ;;  %v1296_v11 = vpop.xlane.xlu1 %1295  ;;  %v1312_v16 = vmul.f32 %v1813_v14, %v1790_v12  ;;  %v1409_v12 = vld [vmem:[%s2781_s11 + $0x20] sm:$0xff]  ;;  %v1364_v14 = vperm.slane %v2646_v38, 1 }
0x1177   :  { %1791 = vrcp.f32 %v1305_v9  ;;  %v1288_v10 = vpop.f32.mrf.mxu1 }
0x1178   :  { %1793 = vrcp.f32 %v1296_v11  ;;  %v1316_v2 = vmul.f32 %v1312_v16, %v1288_v10  ;;  %v1410_v10 = vld [vmem:[%s2781_s11 + $0x28] sm:$0xff] }
0x117d   :  { %v1792_v13 = vpop.eup %1791 }
0x117e   :  { %v1299_v17 = vpop.xlane.xlu0 %1298  ;;  %v1313_v5 = vmul.f32 %v1814_v19, %v1792_v13  ;;  %v1794_v30 = vpop.eup %1793 }
0x117f   :  { %1795 = vrcp.f32 %v1299_v17  ;;  %v1291_v20 = vpop.f32.mrf.mxu1  ;;  %v1310_v15 = vmul.f32 %v1816_v33, %v1794_v30  ;;  %v1408_v17 = vld [vmem:[%s2781_s11 + $0x18] sm:$0xff]  ;;  %v1406_v30 = vld [vmem:[%s2781_s11 + $0x8] sm:$0xff]  ;;  %v1873_v33 = vmov 1  }
0x1180   :  { %v1317_v26 = vmul.f32 %v1313_v5, %v1291_v20  ;;  %v1366_v5 = vperm.slane %v2646_v38, 2  ;;  %1723 = vset.pattern.permute.xlu0 %v1873_v33 }
0x1181   :  { %v1314_v36 = vmul.f32 %v1310_v15, %v1282_v4  ;;  %v1412_v4 = vld [vmem:[%s2781_s11 + $0x38] sm:$0xff] }
0x1182   :  { %1333 = vmatpush.msra.mxu3 %v1317_v26  ;;  %v1407_v26 = vld [vmem:[%s2781_s11 + $0x10] sm:$0xff] }
0x1184   :  { %1334 = vmatpush.msra.mxu3 %v1316_v2 }
0x1185   :  { %v1796_v31 = vpop.eup %1795 }
0x1186   :  { %v1311_v32 = vmul.f32 %v1815_v18, %v1796_v31 }
0x1188   :  { %v1315_v34 = vmul.f32 %v1311_v32, %v1285_v7  ;;  %v1405_v32 = vld [vmem:[%s2781_s11] sm:$0xff] }
0x118a   :  { %1335 = vmatpush.msra.mxu3 %v1315_v34 }
0x118c   :  { %1336 = vmatpush.msra.mxu3 %v1314_v36 }
0x118d   :  { %1714 = vmatmul.msk.f32.vlgmr.msra.gmra.mxu3 %vm369_vm6, %v1817_v37 }
0x1210   :  { %v1338_v40 = vpop.f32.mrf.mxu3 }
0x1211   :  { %v2649_v41 = vadd.f32 %v1338_v40, %v1320_v39 }
0x1213   :  { %1341 = vadd.xlane.f32.xlu0 %v2649_v41  ;;  %v1344_v42 = vmul.f32 %v2649_v41, %v2649_v41 }
0x1215   :  { %1345 = vadd.xlane.f32.xlu1 %v1344_v42  ;;  %v1818_v42 = vld [vmem:[%s2771_s1] sm:$0xff] }
0x1286   :  { %v1342_v53 = vpop.xlane.xlu0 %1341 }
0x1287   :  { %v1343_v55 = vmul.f32 %v1342_v53, %v2189_v35 }
0x1288   :  { %v1346_v28 = vpop.xlane.xlu1 %1345 }
0x1289   :  { %v1348_v56 = vmul.f32 %v1343_v55, %v1343_v55  ;;  %v1347_v59 = vmul.f32 %v1346_v28, %v2189_v35  ;;  %v1417_v35 = vld [vmem:[%s2781_s11 + $0x60] sm:$0xff]  ;;  %v1351_v16 = vsub.f32 %v2649_v41, %v1343_v55 }
0x128a   :  { %1424 = vmatpush.msra.mxu2 %v1417_v35 }
0x128b   :  { %v1349_v29 = vsub.f32 %v1347_v59, %v1348_v56 }
0x128c   :  { %1425 = vmatpush.msra.mxu2 %v1416_v63 }
0x128d   :  { %v1350_v6 = vmax.f32 %v1349_v29, 0.0 }
0x128e   :  { %1426 = vmatpush.msra.mxu2 %v1415_v0 }
0x128f   :  { %v1352_v47 = vadd.f32 1e-05, %v1350_v6 }
0x1290   :  { %1427 = vmatpush.msra.mxu2 %v1414_v57 }
0x1291   :  { %1797 = vrsqrt.f32 %v1352_v47  ;;  %vm1359_vm15 = vweird.f32 %v1352_v47 }
0x1292   :  { %1428 = vmatpush.msra.mxu2 %v1413_v1 }
0x1294   :  { %1429 = vmatpush.msra.mxu2 %v1412_v4 }
0x1296   :  { %1430 = vmatpush.msra.mxu2 %v1411_v8 }
0x1297   :  { %v1798_v58 = vpop.eup %1797 }
0x1298   :  { %v1354_v3 = vmul.f32 %v1798_v58, %v1352_v47  ;;  %vm1360_vm6 = vweird.f32 %v1798_v58  ;;  %1431 = vmatpush.msra.mxu2 %v1410_v10 }
0x1299   :  { %vm1361_vm2 = vmor %vm1359_vm15, %vm1360_vm6 }
0x129a   :  { %v1355_v7 = vmul.f32 %v1798_v58, %v1354_v3  ;;  %1432 = vmatpush.msra.mxu2 %v1409_v12 }
0x129c   :  { %v1356_v9 = vmul.f32 0.5, %v1355_v7  ;;  %1433 = vmatpush.msra.mxu2 %v1408_v17 }
0x129e   :  { %v1357_v11 = vsub.f32 1.5, %v1356_v9  ;;  %1434 = vmatpush.msra.mxu2 %v1407_v26 }
0x12a0   :  { %v1358_v13 = vmul.f32 %v1798_v58, %v1357_v11  ;;  %1435 = vmatpush.msra.mxu2 %v1406_v30 }
0x12a2   :  { %v1362_v19 = vsel %vm1361_vm2, %v1798_v58, %v1358_v13  ;;  %1436 = vmatpush.msra.mxu2 %v1405_v32 }
0x12a3   :  { %v1363_v20 = vmul.f32 %v1362_v19, %v1351_v16 }
0x12a5   :  { %v1365_v2 = vmul.f32 %v1364_v14, %v1363_v20 }
0x12a7   :  { %v1367_v31 = vadd.f32 %v1366_v5, %v1365_v2 }
0x12a9   :  { %v1368_v18 = vmax.f32 %v1367_v31, 0.0 }
0x12ab   :  { %1401 = vmatmul.f32.vlgmr.msrb.gmra.mxu0 %v1368_v18 }
0x1328   :  { %v1402_v15 = vpop.f32.mrf.mxu0 }
0x1329   :  { %1437 = vmatmul.f32.vlgmr.msra.gmra.mxu2 %v1402_v15  ;;  %1508 = vmatpush.msrb.mxu3 %v1402_v15 }
0x13ac   :  { %v1438_v34 = vpop.f32.mrf.mxu2 }
0x13ad   :  { %1441 = vxpose.xlu1.b32.start.end [1/1] (short) (narrow) %v1438_v34, 8  ;;  %1475 = vperm.xlu0 %1723, %v1438_v34  }
0x141f   :  { %v1476_v38 = vpop.permute.xlu0 %1475 }
0x1451   :  { %v1457_v36 = vpop.trf.xlu1 }
0x1452   :  { %v1478_v37 = vperm.slane %v1457_v36, 0 }
0x1454   :  { %v1479_v39 = vadd.f32 %v1478_v37, %v1476_v38 }
0x1456   :  { %v1481_v40 = vmul.f32 0.2, %v1479_v39  ;;  %vm1480_vm3 = vcmp.gt.f32.partialorder %v1479_v39, 0.0 }
0x1458   :  { %v1482_v41 = vsel %vm1480_vm3, %v1479_v39, %v1481_v40 }
0x1459   :  { %v1483_v21 = vadd.f32 %v1818_v42, %v1482_v41 }
0x145b   :  { %v1484_v44 = vsel %vm62_vm0, %v1483_v21, -inf }
0x145c   :  { %1485 = vmax.xlane.f32.xlu2 %v1484_v44 }
0x14cf   :  { %v1486_v22 = vpop.xlane.xlu2 %1485 }
0x14d0   :  { %v1487_v23 = vsub.f32 %v1483_v21, %v1486_v22 }
0x14d2   :  { %v1488_v43 = vmul.f32 1.442695, %v1487_v23 }
0x14d4   :  { %1799 = vpow2.f32 %v1488_v43 }
0x14d5   :  { %1801 = vrcp.f32 %v1874_v25 }
0x14da   :  { %v1800_v45 = vpop.eup %1799 }
0x14db   :  { %1715 = vmatmul.msk.f32.vlgmr.msrb.gmra.mxu3 %vm62_vm0, %v1800_v45  ;;  %v1513_v24 = vsel %vm62_vm0, %v1800_v45, 0.0  ;;  %v1802_v49 = vpop.eup %1801 }
0x14dc   :  { %1514 = vadd.xlane.f32.xlu2 %v1513_v24  ;;  %v1531_v51 = vmul.f32 8.0, %v1802_v49  ;;  %vm1535_vm0 = vweird.f32 %v1802_v49 }
0x14de   :  { %v1532_v54 = vsub.f32 1.0, %v1531_v51 }
0x14e0   :  { %v1533_v61 = vmul.f32 %v1802_v49, %v1532_v54 }
0x14e2   :  { %v1534_v29 = vadd.f32 %v1802_v49, %v1533_v61 }
0x14e4   :  { %v1536_v6 = vsel %vm1535_vm0, %v1802_v49, %v1534_v29 }
0x154f   :  { %v1515_v48 = vpop.xlane.xlu2 %1514 }
0x1550   :  { %1803 = vrcp.f32 %v1515_v48 }
0x1556   :  { %v1804_v52 = vpop.eup %1803 }
0x155e   :  { %v1510_v27 = vpop.f32.mrf.mxu3 }
0x155f   :  { %v1517_v53 = vmul.f32 %v1804_v52, %v1510_v27 }
0x1561   :  { %v1522_v55 = vadd.f32 %v1724_v50, %v1517_v53 }
0x1563   :  { %v1524_v28 = vrot.slane %v1522_v55, 4  ;;  %1523 = vst [vmem:[#allocation2] sm:$0xff] %v1522_v55 }
0x1564   :  { %1549 = dma.vmem_to_hbm [thread:$0]  %s1545_s28, 128, %s1547_s16, [#allocation3]  }
0x1565   :  { %v1525_v56 = vadd.f32 %v1524_v28, %v1522_v55 }
0x1567   :  { %v1526_v59 = vrot.slane %v1525_v56, 2 }
0x1569   :  { %v1527_v60 = vadd.f32 %v1526_v59, %v1525_v56 }
0x156b   :  { %v1528_v62 = vrot.slane %v1527_v60, 1 }
0x156d   :  { %v1529_v46 = vadd.f32 %v1528_v62, %v1527_v60 }
0x156f   :  { %v1537_v47 = vmul.f32 %v1536_v6, %v1529_v46 }
0x1571   :  { %1538 = vst [vmem:[#allocation4] sm:$0x1] %v1537_v47 }
0x1572   :  { %1560 = dma.vmem_to_hbm [thread:$0]  %s1556_s17, 16, %s1558_s19, [#allocation5]  }
0x1573   :  { %1867 = dma.done.wait [#allocation3], 128  }
0x1574   :  { %1868 = vsyncadd [#allocation3], 4294967168 }
0x1575   :  { %1869 = dma.done.wait [#allocation5], 16  }
0x1576   :  { %1870 = vsyncadd [#allocation5], 4294967280 }
0x1577   :  { %1569 = vsyncpa [#allocation3], 1 }
0x1578   :  { %1570 = vsyncpa [#allocation5], 1 }

</bundles_post_ra>
